<compile_context>
chip_gen: v5e
topology: v5e:2x2
jax: 0.10.0
libtpu: 0.0.40
codegen_flags: <defaults>
</compile_context>

<pallas_src>
import functools
import math

import jax
import jax.numpy as jnp
from jax import lax
from jax.experimental import pallas as pl
from jax.experimental.pallas import tpu as pltpu


def mha_kernel(q_ref, k_ref, v_ref,
               wq_ref, wk_ref, wv_ref,
               bq_ref, bk_ref, bv_ref,
               wo_ref, bo_ref,
               *out_and_scratch, nhead, head_dim, need_weights):
    """Grid = (batch, L-tile, KV-tile). KV is the innermost reduction axis."""
    if need_weights:
        out_ref, attnw_ref, q_scr, m_scr, l_scr, acc_scr = out_and_scratch
    else:
        out_ref, q_scr, m_scr, l_scr, acc_scr = out_and_scratch
        attnw_ref = None

    f32 = jnp.float32
    bf16 = jnp.bfloat16
    kv_idx = pl.program_id(2)
    num_kv = pl.num_programs(2)

    # ---- once per (batch, L-tile): project Q (scale pre-folded into Wq/bq),
    #      reset online-softmax state.
    @pl.when(kv_idx == 0)
    def _init():
        q_in = q_ref[0].astype(bf16)                                    # (TL, E)
        q = jnp.dot(q_in, wq_ref[...], preferred_element_type=f32) + bq_ref[...]
        q_scr[...] = q.astype(bf16)
        m_scr[...] = jnp.full(m_scr.shape, -jnp.inf, dtype=m_scr.dtype)
        l_scr[...] = jnp.zeros(l_scr.shape, dtype=l_scr.dtype)
        acc_scr[...] = jnp.zeros(acc_scr.shape, dtype=acc_scr.dtype)

    # ---- per KV tile: project K (already transposed) and V once for all heads.
    # NOTE: K and V projections are kept separate because `key` and `value`
    # may be different tensors (general MHA API); fuse into one (E, 2E)
    # matmul when key is value.
    k_in = k_ref[0].astype(bf16)                                        # (TS, E)
    v_in = v_ref[0].astype(bf16)
    # Kt[o, s] = sum_i Wk_pt[o, i] * k_in[s, i]  ->  (E, TS); one transposed
    # contraction per tile instead of one per head inside the score matmul.
    kt = lax.dot_general(wk_ref[...], k_in, (((1,), (1,)), ((), ())),
                         preferred_element_type=f32) + bk_ref[...]       # (E, TS)
    v = jnp.dot(v_in, wv_ref[...], preferred_element_type=f32) + bv_ref[...]  # (TS, E)
    kt_b = kt.astype(bf16)
    v_b = v.astype(bf16)

    inv_nhead = 1.0 / float(nhead)
    w_acc = None

    # Static loop over heads (nhead is small); per-head state lives in scratch
    # slices so the unrolled loop does not carry (L,S) temporaries across heads.
    for h in range(nhead):
        lo = h * head_dim
        hi = lo + head_dim
        qh = q_scr[:, lo:hi]                                            # (TL, Dh) bf16, pre-scaled
        s = jnp.dot(qh, kt_b[lo:hi, :], preferred_element_type=f32)     # (TL, TS) f32

        m_prev = m_scr[h]                                               # (TL, 1)
        m_new = jnp.maximum(m_prev, jnp.max(s, axis=-1, keepdims=True))
        alpha = jnp.exp(m_prev - m_new)
        p = jnp.exp(s - m_new)                                          # (TL, TS) f32

        l_new = alpha * l_scr[h] + jnp.sum(p, axis=-1, keepdims=True)
        l_scr[h] = l_new
        m_scr[h] = m_new
        acc_scr[:, lo:hi] = alpha * acc_scr[:, lo:hi] + jnp.dot(
            p.astype(bf16), v_b[:, lo:hi], preferred_element_type=f32)

        if need_weights:
            # need_weights path runs with a single KV step (full S resident),
            # so l_new is already the final softmax denominator.
            w = p * (pl.reciprocal(l_new, approx=True) * inv_nhead)
            w_acc = w if w_acc is None else w_acc + w

    if need_weights:
        attnw_ref[0] = w_acc.astype(attnw_ref.dtype)

    # ---- finalize at the last KV tile: per-head normalisation + out-proj.
    @pl.when(kv_idx == num_kv - 1)
    def _finalize():
        for h in range(nhead):
            lo = h * head_dim
            hi = lo + head_dim
            acc_scr[:, lo:hi] = acc_scr[:, lo:hi] * pl.reciprocal(
                l_scr[h], approx=True)
        out = jnp.dot(acc_scr[...].astype(bf16), wo_ref[...],
                      preferred_element_type=f32) + bo_ref[...]
        out_ref[0] = out.astype(out_ref.dtype)


def multihead_attention(query, key, value, params, nhead,
                        need_weights=True, l_tile=None, s_tile=None,
                        vmem_limit_bytes=64 * 1024 * 1024):
    """Pallas-backed equivalent of the PyTorch module's forward (no masks).

    need_weights=True  -> returns (out, head-averaged attn weights); the full
                          S row must stay resident, so the KV axis has 1 step.
    need_weights=False -> returns out only; flash-style KV tiling enabled.
    vmem_limit_bytes   -> tune per generation (roughly halve on v7x: 64 MiB
                          physical vs 128 MiB on v5e/v6e).
    """
    B, L, E = query.shape
    S = key.shape[1]
    head_dim = E // nhead
    assert head_dim * nhead == E

    if l_tile is None:
        l_tile = L
    if need_weights or s_tile is None:
        s_tile = S
    assert L % l_tile == 0 and (l_tile % 8 == 0 or l_tile == L)
    assert S % s_tile == 0 and (s_tile % 8 == 0 or s_tile == S)
    num_l = L // l_tile
    num_kv = S // s_tile

    f32 = jnp.float32
    bf16 = jnp.bfloat16
    scale = 1.0 / math.sqrt(head_dim)

    ipw = params["in_proj_weight"]          # (3E, E), PyTorch (out, in) layout
    ipb = params["in_proj_bias"]            # (3E,)
    # Q path:  Q = q @ WqT ; 1/sqrt(Dh) folded into weight and bias.
    Wq = (ipw[:E].T * scale).astype(bf16)                      # (E_in, E_out)
    bq = (ipb[:E] * scale).reshape(1, E).astype(f32)
    # K path: keep PyTorch (out, in) layout; kernel produces Kt = K^T directly.
    Wk = ipw[E:2 * E].astype(bf16)                             # (E_out, E_in)
    bk = ipb[E:2 * E].reshape(E, 1).astype(f32)                # column bias for Kt
    # V path:  V = v @ WvT.
    Wv = ipw[2 * E:].T.astype(bf16)
    bv = ipb[2 * E:].reshape(1, E).astype(f32)
    Wo = params["out_proj_weight"].T.astype(bf16)
    bo = params["out_proj_bias"].reshape(1, E).astype(f32)

    # Grid-invariant (resident) operands.
    # TODO(synk): on v7x (64 MiB VMEM) consider pipeline_mode=pl.Buffered(1)
    # on these weight specs so they are not double-buffered.
    inv2d = lambda shape: pl.BlockSpec(shape, lambda b, li, kv: (0, 0))
    q_spec = pl.BlockSpec((1, l_tile, E), lambda b, li, kv: (b, li, 0))
    kv_spec = pl.BlockSpec((1, s_tile, E), lambda b, li, kv: (b, kv, 0))
    out_spec = pl.BlockSpec((1, l_tile, E), lambda b, li, kv: (b, li, 0))

    out_specs = [out_spec]
    out_shape = [jax.ShapeDtypeStruct((B, L, E), jnp.float32)]
    if need_weights:
        out_specs.append(pl.BlockSpec((1, l_tile, S), lambda b, li, kv: (b, li, 0)))
        out_shape.append(jax.ShapeDtypeStruct((B, L, S), jnp.float32))

    scratch_shapes = [
        pltpu.VMEM((l_tile, E), bf16),          # projected, pre-scaled Q
        pltpu.VMEM((nhead, l_tile, 1), f32),    # running max per head
        pltpu.VMEM((nhead, l_tile, 1), f32),    # running sum per head
        pltpu.VMEM((l_tile, E), f32),           # output accumulator (all heads)
    ]

    kernel = functools.partial(mha_kernel, nhead=nhead, head_dim=head_dim,
                               need_weights=need_weights)

    results = pl.pallas_call(
        kernel,
        grid=(B, num_l, num_kv),
        in_specs=[
            q_spec, kv_spec, kv_spec,
            inv2d((E, E)),      # Wq (scaled, bf16)
            inv2d((E, E)),      # Wk (PyTorch layout, bf16)
            inv2d((E, E)),      # Wv (bf16)
            inv2d((1, E)),      # bq (scaled)
            inv2d((E, 1)),      # bk (column, for Kt)
            inv2d((1, E)),      # bv
            inv2d((E, E)),      # Wo (bf16)
            inv2d((1, E)),      # bo
        ],
        out_specs=out_specs,
        out_shape=out_shape,
        scratch_shapes=scratch_shapes,
        compiler_params=pltpu.CompilerParams(
            dimension_semantics=("parallel", "parallel", "arbitrary"),
            vmem_limit_bytes=vmem_limit_bytes),
    )(query, key, value, Wq, Wk, Wv, bq, bk, bv, Wo, bo)

    if need_weights:
        return results[0], results[1]
    return results[0]


def reference_mha(query, key, value, params, nhead):
    """Pure-JAX fp32 reference mirroring nn.MultiheadAttention (eval, no masks)."""
    B, L, E = query.shape
    S = key.shape[1]
    Dh = E // nhead
    ipw, ipb = params["in_proj_weight"], params["in_proj_bias"]
    Q = query @ ipw[:E].T + ipb[:E]
    K = key @ ipw[E:2 * E].T + ipb[E:2 * E]
    V = value @ ipw[2 * E:].T + ipb[2 * E:]
    Q = Q.reshape(B, L, nhead, Dh).transpose(0, 2, 1, 3) / math.sqrt(Dh)
    K = K.reshape(B, S, nhead, Dh).transpose(0, 2, 1, 3)
    V = V.reshape(B, S, nhead, Dh).transpose(0, 2, 1, 3)
    scores = jnp.einsum("bhld,bhsd->bhls", Q, K)
    p = jax.nn.softmax(scores, axis=-1)
    o = jnp.einsum("bhls,bhsd->bhld", p, V)
    o = o.transpose(0, 2, 1, 3).reshape(B, L, E)
    out = o @ params["out_proj_weight"].T + params["out_proj_bias"]
    return out, p.mean(axis=1)


if __name__ == "__main__":
    B, L, S, E, nhead = 2, 8, 16, 32, 4

    key0 = jax.random.PRNGKey(0)
    k1, k2, k3, k4, k5, k6, k7 = jax.random.split(key0, 7)

    xavier = math.sqrt(6.0 / (E + E))
    params = {
        "in_proj_weight": jax.random.uniform(k1, (3 * E, E), jnp.float32,
                                             -xavier, xavier),
        "in_proj_bias": jax.random.uniform(k2, (3 * E,), jnp.float32, -0.1, 0.1),
        "out_proj_weight": jax.random.uniform(k3, (E, E), jnp.float32,
                                              -xavier, xavier),
        "out_proj_bias": jax.random.uniform(k4, (E,), jnp.float32, -0.1, 0.1),
    }

    query = jax.random.normal(k5, (B, L, E), jnp.float32)
    key_t = jax.random.normal(k6, (B, S, E), jnp.float32)
    value = jax.random.normal(k7, (B, S, E), jnp.float32)

    # Default path: matches the module's forward (return_attn_weights=True).
    out, attnw = multihead_attention(query, key_t, value, params, nhead)
    out = jax.block_until_ready(out)
    attnw = jax.block_until_ready(attnw)

    # Fast path: no attention weights, flash-style KV tiling (2 KV tiles here).
    out_fast = multihead_attention(query, key_t, value, params, nhead,
                                   need_weights=False, s_tile=8)
    out_fast = jax.block_until_ready(out_fast)

    ref_out, ref_w = reference_mha(query, key_t, value, params, nhead)
    assert out.shape == (B, L, E) and attnw.shape == (B, L, S)
    assert out_fast.shape == (B, L, E)
    # bf16 MXU operands + approx reciprocal vs fp32 reference -> loose tolerances.
    assert jnp.allclose(out, ref_out, atol=5e-2, rtol=5e-2)
    assert jnp.allclose(out_fast, ref_out, atol=5e-2, rtol=5e-2)
    assert jnp.allclose(attnw, ref_w, atol=1e-2, rtol=5e-2)

    # TODO(synk): attn_mask / key_padding_mask / pos_embs / dropout>0 paths are
    # not exercised by this synthetic forward (all None / 0.0 as in defaults).
    print("KERNEL_OK")
</pallas_src>

<mosaic_0001>
module attributes {stable_mosaic.version = 11 : i64} {
  func.func @mha_kernel(%arg0: i32, %arg1: i32, %arg2: i32, %arg3: memref<1x8x32xf32, #tpu.memory_space<vmem>>, %arg4: memref<1x16x32xf32, #tpu.memory_space<vmem>>, %arg5: memref<1x16x32xf32, #tpu.memory_space<vmem>>, %arg6: memref<32x32xbf16, #tpu.memory_space<vmem>>, %arg7: memref<32x32xbf16, #tpu.memory_space<vmem>>, %arg8: memref<32x32xbf16, #tpu.memory_space<vmem>>, %arg9: memref<1x32xf32, #tpu.memory_space<vmem>>, %arg10: memref<32x1xf32, #tpu.memory_space<vmem>>, %arg11: memref<1x32xf32, #tpu.memory_space<vmem>>, %arg12: memref<32x32xbf16, #tpu.memory_space<vmem>>, %arg13: memref<1x32xf32, #tpu.memory_space<vmem>>, %arg14: memref<1x8x32xf32, #tpu.memory_space<vmem>>, %arg15: memref<1x8x16xf32, #tpu.memory_space<vmem>>, %arg16: memref<8x32xbf16, #tpu.memory_space<vmem>>, %arg17: memref<4x8x1xf32, #tpu.memory_space<vmem>>, %arg18: memref<4x8x1xf32, #tpu.memory_space<vmem>>, %arg19: memref<8x32xf32, #tpu.memory_space<vmem>>) attributes {dimension_semantics = [#tpu.dimension_semantics<parallel>, #tpu.dimension_semantics<parallel>, #tpu.dimension_semantics<arbitrary>], iteration_bounds = array<i64: 2, 1, 1>, scalar_prefetch = 0 : i64, scratch_operands = 4 : i64, tpu.core_type = #tpu.core_type<tc>, window_params = [{transform_indices = @transform_0, window_bounds = array<i64: 1, 8, 32>}, {transform_indices = @transform_1, window_bounds = array<i64: 1, 16, 32>}, {transform_indices = @transform_2, window_bounds = array<i64: 1, 16, 32>}, {pipeline_mode = #tpu.pipeline_mode<synchronous>, transform_indices = @transform_3, window_bounds = array<i64: 32, 32>}, {pipeline_mode = #tpu.pipeline_mode<synchronous>, transform_indices = @transform_4, window_bounds = array<i64: 32, 32>}, {pipeline_mode = #tpu.pipeline_mode<synchronous>, transform_indices = @transform_5, window_bounds = array<i64: 32, 32>}, {pipeline_mode = #tpu.pipeline_mode<synchronous>, transform_indices = @transform_6, window_bounds = array<i64: 1, 32>}, {pipeline_mode = #tpu.pipeline_mode<synchronous>, transform_indices = @transform_7, window_bounds = array<i64: 32, 1>}, {pipeline_mode = #tpu.pipeline_mode<synchronous>, transform_indices = @transform_8, window_bounds = array<i64: 1, 32>}, {pipeline_mode = #tpu.pipeline_mode<synchronous>, transform_indices = @transform_9, window_bounds = array<i64: 32, 32>}, {pipeline_mode = #tpu.pipeline_mode<synchronous>, transform_indices = @transform_10, window_bounds = array<i64: 1, 32>}, {transform_indices = @transform_11, window_bounds = array<i64: 1, 8, 32>}, {transform_indices = @transform_12, window_bounds = array<i64: 1, 8, 16>}]} {
    %c0_i32 = arith.constant 0 : i32
    %0 = arith.cmpi eq, %arg2, %c0_i32 : i32
    %1 = arith.extui %0 : i1 to i32
    %c0_i32_0 = arith.constant 0 : i32
    %2 = arith.cmpi ne, %1, %c0_i32_0 : i32
    scf.if %2 {
      %c0_106 = arith.constant 0 : index
      %c0_107 = arith.constant 0 : index
      %c0_108 = arith.constant 0 : index
      %182 = vector.load %arg3[%c0_106, %c0_107, %c0_108] : memref<1x8x32xf32, #tpu.memory_space<vmem>>, vector<1x8x32xf32>
      %183 = vector.shape_cast %182 : vector<1x8x32xf32> to vector<8x32xf32>
      %184 = arith.truncf %183 : vector<8x32xf32> to vector<8x32xbf16>
      %c0_109 = arith.constant 0 : index
      %c0_110 = arith.constant 0 : index
      %185 = vector.load %arg6[%c0_109, %c0_110] : memref<32x32xbf16, #tpu.memory_space<vmem>>, vector<32x32xbf16>
      %cst_111 = arith.constant dense<0.000000e+00> : vector<8x32xf32>
      %186 = tpu.matmul %184, %185, %cst_111 {dimension_numbers = #tpu.dot_dimension_numbers<[1], [0], [0], [1], [0, 0, 1, 1], [], []>} : vector<8x32xbf16>, vector<32x32xbf16>, vector<8x32xf32> -> vector<8x32xf32>
      %c0_112 = arith.constant 0 : index
      %c0_113 = arith.constant 0 : index
      %187 = vector.load %arg9[%c0_112, %c0_113] : memref<1x32xf32, #tpu.memory_space<vmem>>, vector<1x32xf32>
      %188 = vector.broadcast %187 : vector<1x32xf32> to vector<8x32xf32>
      %189 = arith.addf %186, %188 : vector<8x32xf32>
      %190 = arith.truncf %189 : vector<8x32xf32> to vector<8x32xbf16>
      %c0_114 = arith.constant 0 : index
      %c0_115 = arith.constant 0 : index
      %191 = vector.load %arg16[%c0_114, %c0_115] : memref<8x32xbf16, #tpu.memory_space<vmem>>, vector<8x32xbf16>
      tpu.vector_store %arg16[%c0_114, %c0_115], %190 {strides = array<i32>} : memref<8x32xbf16, #tpu.memory_space<vmem>>, vector<8x32xbf16>,
      %cst_116 = arith.constant 0xFF800000 : f32
      %192 = vector.broadcast %cst_116 : f32 to vector<4x8x1xf32>
      %c0_117 = arith.constant 0 : index
      %c0_118 = arith.constant 0 : index
      %c0_119 = arith.constant 0 : index
      %193 = vector.load %arg17[%c0_117, %c0_118, %c0_119] : memref<4x8x1xf32, #tpu.memory_space<vmem>>, vector<4x8x1xf32>
      tpu.vector_store %arg17[%c0_117, %c0_118, %c0_119], %192 {strides = array<i32>} : memref<4x8x1xf32, #tpu.memory_space<vmem>>, vector<4x8x1xf32>,
      %cst_120 = arith.constant 0.000000e+00 : f32
      %194 = vector.broadcast %cst_120 : f32 to vector<4x8x1xf32>
      %c0_121 = arith.constant 0 : index
      %c0_122 = arith.constant 0 : index
      %c0_123 = arith.constant 0 : index
      %195 = vector.load %arg18[%c0_121, %c0_122, %c0_123] : memref<4x8x1xf32, #tpu.memory_space<vmem>>, vector<4x8x1xf32>
      tpu.vector_store %arg18[%c0_121, %c0_122, %c0_123], %194 {strides = array<i32>} : memref<4x8x1xf32, #tpu.memory_space<vmem>>, vector<4x8x1xf32>,
      %cst_124 = arith.constant 0.000000e+00 : f32
      %196 = vector.broadcast %cst_124 : f32 to vector<8x32xf32>
      %c0_125 = arith.constant 0 : index
      %c0_126 = arith.constant 0 : index
      %197 = vector.load %arg19[%c0_125, %c0_126] : memref<8x32xf32, #tpu.memory_space<vmem>>, vector<8x32xf32>
      tpu.vector_store %arg19[%c0_125, %c0_126], %196 {strides = array<i32>} : memref<8x32xf32, #tpu.memory_space<vmem>>, vector<8x32xf32>,
    } else {
    }
    %c0 = arith.constant 0 : index
    %c0_1 = arith.constant 0 : index
    %c0_2 = arith.constant 0 : index
    %3 = vector.load %arg4[%c0, %c0_1, %c0_2] : memref<1x16x32xf32, #tpu.memory_space<vmem>>, vector<1x16x32xf32>
    %4 = vector.shape_cast %3 : vector<1x16x32xf32> to vector<16x32xf32>
    %5 = arith.truncf %4 : vector<16x32xf32> to vector<16x32xbf16>
    %c0_3 = arith.constant 0 : index
    %c0_4 = arith.constant 0 : index
    %c0_5 = arith.constant 0 : index
    %6 = vector.load %arg5[%c0_3, %c0_4, %c0_5] : memref<1x16x32xf32, #tpu.memory_space<vmem>>, vector<1x16x32xf32>
    %7 = vector.shape_cast %6 : vector<1x16x32xf32> to vector<16x32xf32>
    %8 = arith.truncf %7 : vector<16x32xf32> to vector<16x32xbf16>
    %c0_6 = arith.constant 0 : index
    %c0_7 = arith.constant 0 : index
    %9 = vector.load %arg7[%c0_6, %c0_7] : memref<32x32xbf16, #tpu.memory_space<vmem>>, vector<32x32xbf16>
    %cst = arith.constant dense<0.000000e+00> : vector<32x16xf32>
    %10 = tpu.matmul %9, %5, %cst {dimension_numbers = #tpu.dot_dimension_numbers<[1], [1], [0], [0], [0, 0, 1, 0], [], []>} : vector<32x32xbf16>, vector<16x32xbf16>, vector<32x16xf32> -> vector<32x16xf32>
    %c0_8 = arith.constant 0 : index
    %c0_9 = arith.constant 0 : index
    %11 = vector.load %arg10[%c0_8, %c0_9] : memref<32x1xf32, #tpu.memory_space<vmem>>, vector<32x1xf32>
    %12 = vector.broadcast %11 : vector<32x1xf32> to vector<32x16xf32>
    %13 = arith.addf %10, %12 : vector<32x16xf32>
    %c0_10 = arith.constant 0 : index
    %c0_11 = arith.constant 0 : index
    %14 = vector.load %arg8[%c0_10, %c0_11] : memref<32x32xbf16, #tpu.memory_space<vmem>>, vector<32x32xbf16>
    %cst_12 = arith.constant dense<0.000000e+00> : vector<16x32xf32>
    %15 = tpu.matmul %8, %14, %cst_12 {dimension_numbers = #tpu.dot_dimension_numbers<[1], [0], [0], [1], [0, 0, 1, 1], [], []>} : vector<16x32xbf16>, vector<32x32xbf16>, vector<16x32xf32> -> vector<16x32xf32>
    %c0_13 = arith.constant 0 : index
    %c0_14 = arith.constant 0 : index
    %16 = vector.load %arg11[%c0_13, %c0_14] : memref<1x32xf32, #tpu.memory_space<vmem>>, vector<1x32xf32>
    %17 = vector.broadcast %16 : vector<1x32xf32> to vector<16x32xf32>
    %18 = arith.addf %15, %17 : vector<16x32xf32>
    %19 = arith.truncf %13 : vector<32x16xf32> to vector<32x16xbf16>
    %20 = arith.truncf %18 : vector<16x32xf32> to vector<16x32xbf16>
    %c0_15 = arith.constant 0 : index
    %c0_16 = arith.constant 0 : index
    %21 = vector.load %arg16[%c0_15, %c0_16] : memref<8x32xbf16, #tpu.memory_space<vmem>>, vector<8x8xbf16>
    %22 = vector.extract_strided_slice %19 {offsets = [0, 0], sizes = [8, 16], strides = [1, 1]} : vector<32x16xbf16> to vector<8x16xbf16>
    %cst_17 = arith.constant dense<0.000000e+00> : vector<8x16xf32>
    %23 = tpu.matmul %21, %22, %cst_17 {dimension_numbers = #tpu.dot_dimension_numbers<[1], [0], [0], [1], [0, 0, 1, 1], [], []>} : vector<8x8xbf16>, vector<8x16xbf16>, vector<8x16xf32> -> vector<8x16xf32>
    %c0_18 = arith.constant 0 : index
    %c0_19 = arith.constant 0 : index
    %c0_20 = arith.constant 0 : index
    %24 = vector.load %arg17[%c0_18, %c0_19, %c0_20] : memref<4x8x1xf32, #tpu.memory_space<vmem>>, vector<1x8x1xf32>
    %25 = vector.shape_cast %24 : vector<1x8x1xf32> to vector<8x1xf32>
    %cst_21 = arith.constant dense<0xFF800000> : vector<8xf32>
    %26 = vector.multi_reduction <maximumf>, %23, %cst_21 [1] : vector<8x16xf32> to vector<8xf32>
    %27 = vector.shape_cast %26 : vector<8xf32> to vector<8x1xf32>
    %28 = arith.maximumf %25, %27 : vector<8x1xf32>
    %29 = arith.subf %25, %28 : vector<8x1xf32>
    %30 = math.exp %29 : vector<8x1xf32>
    %31 = vector.broadcast %28 : vector<8x1xf32> to vector<8x16xf32>
    %32 = arith.subf %23, %31 : vector<8x16xf32>
    %33 = math.exp %32 : vector<8x16xf32>
    %c0_22 = arith.constant 0 : index
    %c0_23 = arith.constant 0 : index
    %c0_24 = arith.constant 0 : index
    %34 = vector.load %arg18[%c0_22, %c0_23, %c0_24] : memref<4x8x1xf32, #tpu.memory_space<vmem>>, vector<1x8x1xf32>
    %35 = vector.shape_cast %34 : vector<1x8x1xf32> to vector<8x1xf32>
    %36 = arith.mulf %30, %35 : vector<8x1xf32>
    %cst_25 = arith.constant dense<0.000000e+00> : vector<8xf32>
    %37 = vector.multi_reduction <add>, %33, %cst_25 [1] : vector<8x16xf32> to vector<8xf32>
    %38 = vector.shape_cast %37 : vector<8xf32> to vector<8x1xf32>
    %39 = arith.addf %36, %38 : vector<8x1xf32>
    %c0_26 = arith.constant 0 : index
    %c0_27 = arith.constant 0 : index
    %c0_28 = arith.constant 0 : index
    %40 = vector.load %arg18[%c0_26, %c0_27, %c0_28] : memref<4x8x1xf32, #tpu.memory_space<vmem>>, vector<1x8x1xf32>
    %41 = vector.shape_cast %40 : vector<1x8x1xf32> to vector<8x1xf32>
    %42 = vector.shape_cast %39 : vector<8x1xf32> to vector<1x8x1xf32>
    tpu.vector_store %arg18[%c0_26, %c0_27, %c0_28], %42 {strides = array<i32>} : memref<4x8x1xf32, #tpu.memory_space<vmem>>, vector<1x8x1xf32>,
    %c0_29 = arith.constant 0 : index
    %c0_30 = arith.constant 0 : index
    %c0_31 = arith.constant 0 : index
    %43 = vector.load %arg17[%c0_29, %c0_30, %c0_31] : memref<4x8x1xf32, #tpu.memory_space<vmem>>, vector<1x8x1xf32>
    %44 = vector.shape_cast %43 : vector<1x8x1xf32> to vector<8x1xf32>
    %45 = vector.shape_cast %28 : vector<8x1xf32> to vector<1x8x1xf32>
    tpu.vector_store %arg17[%c0_29, %c0_30, %c0_31], %45 {strides = array<i32>} : memref<4x8x1xf32, #tpu.memory_space<vmem>>, vector<1x8x1xf32>,
    %c0_32 = arith.constant 0 : index
    %c0_33 = arith.constant 0 : index
    %46 = vector.load %arg19[%c0_32, %c0_33] : memref<8x32xf32, #tpu.memory_space<vmem>>, vector<8x8xf32>
    %47 = vector.broadcast %30 : vector<8x1xf32> to vector<8x8xf32>
    %48 = arith.mulf %47, %46 : vector<8x8xf32>
    %49 = arith.truncf %33 : vector<8x16xf32> to vector<8x16xbf16>
    %50 = vector.extract_strided_slice %20 {offsets = [0, 0], sizes = [16, 8], strides = [1, 1]} : vector<16x32xbf16> to vector<16x8xbf16>
    %cst_34 = arith.constant dense<0.000000e+00> : vector<8x8xf32>
    %51 = tpu.matmul %49, %50, %cst_34 {dimension_numbers = #tpu.dot_dimension_numbers<[1], [0], [0], [1], [0, 0, 1, 1], [], []>} : vector<8x16xbf16>, vector<16x8xbf16>, vector<8x8xf32> -> vector<8x8xf32>
    %52 = arith.addf %48, %51 : vector<8x8xf32>
    %c0_35 = arith.constant 0 : index
    %c0_36 = arith.constant 0 : index
    %53 = vector.load %arg19[%c0_35, %c0_36] : memref<8x32xf32, #tpu.memory_space<vmem>>, vector<8x8xf32>
    tpu.vector_store %arg19[%c0_35, %c0_36], %52 {strides = array<i32>} : memref<8x32xf32, #tpu.memory_space<vmem>>, vector<8x8xf32>,
    %54 = tpu.reciprocal %39 {approx = true} : vector<8x1xf32> -> vector<8x1xf32>
    %cst_37 = arith.constant 2.500000e-01 : f32
    %55 = vector.broadcast %cst_37 : f32 to vector<8x1xf32>
    %56 = arith.mulf %54, %55 : vector<8x1xf32>
    %57 = vector.broadcast %56 : vector<8x1xf32> to vector<8x16xf32>
    %58 = arith.mulf %33, %57 : vector<8x16xf32>
    %c0_38 = arith.constant 0 : index
    %c8 = arith.constant 8 : index
    %59 = vector.load %arg16[%c0_38, %c8] : memref<8x32xbf16, #tpu.memory_space<vmem>>, vector<8x8xbf16>
    %60 = vector.extract_strided_slice %19 {offsets = [8, 0], sizes = [8, 16], strides = [1, 1]} : vector<32x16xbf16> to vector<8x16xbf16>
    %cst_39 = arith.constant dense<0.000000e+00> : vector<8x16xf32>
    %61 = tpu.matmul %59, %60, %cst_39 {dimension_numbers = #tpu.dot_dimension_numbers<[1], [0], [0], [1], [0, 0, 1, 1], [], []>} : vector<8x8xbf16>, vector<8x16xbf16>, vector<8x16xf32> -> vector<8x16xf32>
    %c1 = arith.constant 1 : index
    %c0_40 = arith.constant 0 : index
    %c0_41 = arith.constant 0 : index
    %62 = vector.load %arg17[%c1, %c0_40, %c0_41] : memref<4x8x1xf32, #tpu.memory_space<vmem>>, vector<1x8x1xf32>
    %63 = vector.shape_cast %62 : vector<1x8x1xf32> to vector<8x1xf32>
    %cst_42 = arith.constant dense<0xFF800000> : vector<8xf32>
    %64 = vector.multi_reduction <maximumf>, %61, %cst_42 [1] : vector<8x16xf32> to vector<8xf32>
    %65 = vector.shape_cast %64 : vector<8xf32> to vector<8x1xf32>
    %66 = arith.maximumf %63, %65 : vector<8x1xf32>
    %67 = arith.subf %63, %66 : vector<8x1xf32>
    %68 = math.exp %67 : vector<8x1xf32>
    %69 = vector.broadcast %66 : vector<8x1xf32> to vector<8x16xf32>
    %70 = arith.subf %61, %69 : vector<8x16xf32>
    %71 = math.exp %70 : vector<8x16xf32>
    %c1_43 = arith.constant 1 : index
    %c0_44 = arith.constant 0 : index
    %c0_45 = arith.constant 0 : index
    %72 = vector.load %arg18[%c1_43, %c0_44, %c0_45] : memref<4x8x1xf32, #tpu.memory_space<vmem>>, vector<1x8x1xf32>
    %73 = vector.shape_cast %72 : vector<1x8x1xf32> to vector<8x1xf32>
    %74 = arith.mulf %68, %73 : vector<8x1xf32>
    %cst_46 = arith.constant dense<0.000000e+00> : vector<8xf32>
    %75 = vector.multi_reduction <add>, %71, %cst_46 [1] : vector<8x16xf32> to vector<8xf32>
    %76 = vector.shape_cast %75 : vector<8xf32> to vector<8x1xf32>
    %77 = arith.addf %74, %76 : vector<8x1xf32>
    %c1_47 = arith.constant 1 : index
    %c0_48 = arith.constant 0 : index
    %c0_49 = arith.constant 0 : index
    %78 = vector.load %arg18[%c1_47, %c0_48, %c0_49] : memref<4x8x1xf32, #tpu.memory_space<vmem>>, vector<1x8x1xf32>
    %79 = vector.shape_cast %78 : vector<1x8x1xf32> to vector<8x1xf32>
    %80 = vector.shape_cast %77 : vector<8x1xf32> to vector<1x8x1xf32>
    tpu.vector_store %arg18[%c1_47, %c0_48, %c0_49], %80 {strides = array<i32>} : memref<4x8x1xf32, #tpu.memory_space<vmem>>, vector<1x8x1xf32>,
    %c1_50 = arith.constant 1 : index
    %c0_51 = arith.constant 0 : index
    %c0_52 = arith.constant 0 : index
    %81 = vector.load %arg17[%c1_50, %c0_51, %c0_52] : memref<4x8x1xf32, #tpu.memory_space<vmem>>, vector<1x8x1xf32>
    %82 = vector.shape_cast %81 : vector<1x8x1xf32> to vector<8x1xf32>
    %83 = vector.shape_cast %66 : vector<8x1xf32> to vector<1x8x1xf32>
    tpu.vector_store %arg17[%c1_50, %c0_51, %c0_52], %83 {strides = array<i32>} : memref<4x8x1xf32, #tpu.memory_space<vmem>>, vector<1x8x1xf32>,
    %c0_53 = arith.constant 0 : index
    %c8_54 = arith.constant 8 : index
    %84 = vector.load %arg19[%c0_53, %c8_54] : memref<8x32xf32, #tpu.memory_space<vmem>>, vector<8x8xf32>
    %85 = vector.broadcast %68 : vector<8x1xf32> to vector<8x8xf32>
    %86 = arith.mulf %85, %84 : vector<8x8xf32>
    %87 = arith.truncf %71 : vector<8x16xf32> to vector<8x16xbf16>
    %88 = vector.extract_strided_slice %20 {offsets = [0, 8], sizes = [16, 8], strides = [1, 1]} : vector<16x32xbf16> to vector<16x8xbf16>
    %cst_55 = arith.constant dense<0.000000e+00> : vector<8x8xf32>
    %89 = tpu.matmul %87, %88, %cst_55 {dimension_numbers = #tpu.dot_dimension_numbers<[1], [0], [0], [1], [0, 0, 1, 1], [], []>} : vector<8x16xbf16>, vector<16x8xbf16>, vector<8x8xf32> -> vector<8x8xf32>
    %90 = arith.addf %86, %89 : vector<8x8xf32>
    %c0_56 = arith.constant 0 : index
    %c8_57 = arith.constant 8 : index
    %91 = vector.load %arg19[%c0_56, %c8_57] : memref<8x32xf32, #tpu.memory_space<vmem>>, vector<8x8xf32>
    tpu.vector_store %arg19[%c0_56, %c8_57], %90 {strides = array<i32>} : memref<8x32xf32, #tpu.memory_space<vmem>>, vector<8x8xf32>,
    %92 = tpu.reciprocal %77 {approx = true} : vector<8x1xf32> -> vector<8x1xf32>
    %cst_58 = arith.constant 2.500000e-01 : f32
    %93 = vector.broadcast %cst_58 : f32 to vector<8x1xf32>
    %94 = arith.mulf %92, %93 : vector<8x1xf32>
    %95 = vector.broadcast %94 : vector<8x1xf32> to vector<8x16xf32>
    %96 = arith.mulf %71, %95 : vector<8x16xf32>
    %97 = arith.addf %58, %96 : vector<8x16xf32>
    %c0_59 = arith.constant 0 : index
    %c16 = arith.constant 16 : index
    %98 = vector.load %arg16[%c0_59, %c16] : memref<8x32xbf16, #tpu.memory_space<vmem>>, vector<8x8xbf16>
    %99 = vector.extract_strided_slice %19 {offsets = [16, 0], sizes = [8, 16], strides = [1, 1]} : vector<32x16xbf16> to vector<8x16xbf16>
    %cst_60 = arith.constant dense<0.000000e+00> : vector<8x16xf32>
    %100 = tpu.matmul %98, %99, %cst_60 {dimension_numbers = #tpu.dot_dimension_numbers<[1], [0], [0], [1], [0, 0, 1, 1], [], []>} : vector<8x8xbf16>, vector<8x16xbf16>, vector<8x16xf32> -> vector<8x16xf32>
    %c2 = arith.constant 2 : index
    %c0_61 = arith.constant 0 : index
    %c0_62 = arith.constant 0 : index
    %101 = vector.load %arg17[%c2, %c0_61, %c0_62] : memref<4x8x1xf32, #tpu.memory_space<vmem>>, vector<1x8x1xf32>
    %102 = vector.shape_cast %101 : vector<1x8x1xf32> to vector<8x1xf32>
    %cst_63 = arith.constant dense<0xFF800000> : vector<8xf32>
    %103 = vector.multi_reduction <maximumf>, %100, %cst_63 [1] : vector<8x16xf32> to vector<8xf32>
    %104 = vector.shape_cast %103 : vector<8xf32> to vector<8x1xf32>
    %105 = arith.maximumf %102, %104 : vector<8x1xf32>
    %106 = arith.subf %102, %105 : vector<8x1xf32>
    %107 = math.exp %106 : vector<8x1xf32>
    %108 = vector.broadcast %105 : vector<8x1xf32> to vector<8x16xf32>
    %109 = arith.subf %100, %108 : vector<8x16xf32>
    %110 = math.exp %109 : vector<8x16xf32>
    %c2_64 = arith.constant 2 : index
    %c0_65 = arith.constant 0 : index
    %c0_66 = arith.constant 0 : index
    %111 = vector.load %arg18[%c2_64, %c0_65, %c0_66] : memref<4x8x1xf32, #tpu.memory_space<vmem>>, vector<1x8x1xf32>
    %112 = vector.shape_cast %111 : vector<1x8x1xf32> to vector<8x1xf32>
    %113 = arith.mulf %107, %112 : vector<8x1xf32>
    %cst_67 = arith.constant dense<0.000000e+00> : vector<8xf32>
    %114 = vector.multi_reduction <add>, %110, %cst_67 [1] : vector<8x16xf32> to vector<8xf32>
    %115 = vector.shape_cast %114 : vector<8xf32> to vector<8x1xf32>
    %116 = arith.addf %113, %115 : vector<8x1xf32>
    %c2_68 = arith.constant 2 : index
    %c0_69 = arith.constant 0 : index
    %c0_70 = arith.constant 0 : index
    %117 = vector.load %arg18[%c2_68, %c0_69, %c0_70] : memref<4x8x1xf32, #tpu.memory_space<vmem>>, vector<1x8x1xf32>
    %118 = vector.shape_cast %117 : vector<1x8x1xf32> to vector<8x1xf32>
    %119 = vector.shape_cast %116 : vector<8x1xf32> to vector<1x8x1xf32>
    tpu.vector_store %arg18[%c2_68, %c0_69, %c0_70], %119 {strides = array<i32>} : memref<4x8x1xf32, #tpu.memory_space<vmem>>, vector<1x8x1xf32>,
    %c2_71 = arith.constant 2 : index
    %c0_72 = arith.constant 0 : index
    %c0_73 = arith.constant 0 : index
    %120 = vector.load %arg17[%c2_71, %c0_72, %c0_73] : memref<4x8x1xf32, #tpu.memory_space<vmem>>, vector<1x8x1xf32>
    %121 = vector.shape_cast %120 : vector<1x8x1xf32> to vector<8x1xf32>
    %122 = vector.shape_cast %105 : vector<8x1xf32> to vector<1x8x1xf32>
    tpu.vector_store %arg17[%c2_71, %c0_72, %c0_73], %122 {strides = array<i32>} : memref<4x8x1xf32, #tpu.memory_space<vmem>>, vector<1x8x1xf32>,
    %c0_74 = arith.constant 0 : index
    %c16_75 = arith.constant 16 : index
    %123 = vector.load %arg19[%c0_74, %c16_75] : memref<8x32xf32, #tpu.memory_space<vmem>>, vector<8x8xf32>
    %124 = vector.broadcast %107 : vector<8x1xf32> to vector<8x8xf32>
    %125 = arith.mulf %124, %123 : vector<8x8xf32>
    %126 = arith.truncf %110 : vector<8x16xf32> to vector<8x16xbf16>
    %127 = vector.extract_strided_slice %20 {offsets = [0, 16], sizes = [16, 8], strides = [1, 1]} : vector<16x32xbf16> to vector<16x8xbf16>
    %cst_76 = arith.constant dense<0.000000e+00> : vector<8x8xf32>
    %128 = tpu.matmul %126, %127, %cst_76 {dimension_numbers = #tpu.dot_dimension_numbers<[1], [0], [0], [1], [0, 0, 1, 1], [], []>} : vector<8x16xbf16>, vector<16x8xbf16>, vector<8x8xf32> -> vector<8x8xf32>
    %129 = arith.addf %125, %128 : vector<8x8xf32>
    %c0_77 = arith.constant 0 : index
    %c16_78 = arith.constant 16 : index
    %130 = vector.load %arg19[%c0_77, %c16_78] : memref<8x32xf32, #tpu.memory_space<vmem>>, vector<8x8xf32>
    tpu.vector_store %arg19[%c0_77, %c16_78], %129 {strides = array<i32>} : memref<8x32xf32, #tpu.memory_space<vmem>>, vector<8x8xf32>,
    %131 = tpu.reciprocal %116 {approx = true} : vector<8x1xf32> -> vector<8x1xf32>
    %cst_79 = arith.constant 2.500000e-01 : f32
    %132 = vector.broadcast %cst_79 : f32 to vector<8x1xf32>
    %133 = arith.mulf %131, %132 : vector<8x1xf32>
    %134 = vector.broadcast %133 : vector<8x1xf32> to vector<8x16xf32>
    %135 = arith.mulf %110, %134 : vector<8x16xf32>
    %136 = arith.addf %97, %135 : vector<8x16xf32>
    %c0_80 = arith.constant 0 : index
    %c24 = arith.constant 24 : index
    %137 = vector.load %arg16[%c0_80, %c24] : memref<8x32xbf16, #tpu.memory_space<vmem>>, vector<8x8xbf16>
    %138 = vector.extract_strided_slice %19 {offsets = [24, 0], sizes = [8, 16], strides = [1, 1]} : vector<32x16xbf16> to vector<8x16xbf16>
    %cst_81 = arith.constant dense<0.000000e+00> : vector<8x16xf32>
    %139 = tpu.matmul %137, %138, %cst_81 {dimension_numbers = #tpu.dot_dimension_numbers<[1], [0], [0], [1], [0, 0, 1, 1], [], []>} : vector<8x8xbf16>, vector<8x16xbf16>, vector<8x16xf32> -> vector<8x16xf32>
    %c3 = arith.constant 3 : index
    %c0_82 = arith.constant 0 : index
    %c0_83 = arith.constant 0 : index
    %140 = vector.load %arg17[%c3, %c0_82, %c0_83] : memref<4x8x1xf32, #tpu.memory_space<vmem>>, vector<1x8x1xf32>
    %141 = vector.shape_cast %140 : vector<1x8x1xf32> to vector<8x1xf32>
    %cst_84 = arith.constant dense<0xFF800000> : vector<8xf32>
    %142 = vector.multi_reduction <maximumf>, %139, %cst_84 [1] : vector<8x16xf32> to vector<8xf32>
    %143 = vector.shape_cast %142 : vector<8xf32> to vector<8x1xf32>
    %144 = arith.maximumf %141, %143 : vector<8x1xf32>
    %145 = arith.subf %141, %144 : vector<8x1xf32>
    %146 = math.exp %145 : vector<8x1xf32>
    %147 = vector.broadcast %144 : vector<8x1xf32> to vector<8x16xf32>
    %148 = arith.subf %139, %147 : vector<8x16xf32>
    %149 = math.exp %148 : vector<8x16xf32>
    %c3_85 = arith.constant 3 : index
    %c0_86 = arith.constant 0 : index
    %c0_87 = arith.constant 0 : index
    %150 = vector.load %arg18[%c3_85, %c0_86, %c0_87] : memref<4x8x1xf32, #tpu.memory_space<vmem>>, vector<1x8x1xf32>
    %151 = vector.shape_cast %150 : vector<1x8x1xf32> to vector<8x1xf32>
    %152 = arith.mulf %146, %151 : vector<8x1xf32>
    %cst_88 = arith.constant dense<0.000000e+00> : vector<8xf32>
    %153 = vector.multi_reduction <add>, %149, %cst_88 [1] : vector<8x16xf32> to vector<8xf32>
    %154 = vector.shape_cast %153 : vector<8xf32> to vector<8x1xf32>
    %155 = arith.addf %152, %154 : vector<8x1xf32>
    %c3_89 = arith.constant 3 : index
    %c0_90 = arith.constant 0 : index
    %c0_91 = arith.constant 0 : index
    %156 = vector.load %arg18[%c3_89, %c0_90, %c0_91] : memref<4x8x1xf32, #tpu.memory_space<vmem>>, vector<1x8x1xf32>
    %157 = vector.shape_cast %156 : vector<1x8x1xf32> to vector<8x1xf32>
    %158 = vector.shape_cast %155 : vector<8x1xf32> to vector<1x8x1xf32>
    tpu.vector_store %arg18[%c3_89, %c0_90, %c0_91], %158 {strides = array<i32>} : memref<4x8x1xf32, #tpu.memory_space<vmem>>, vector<1x8x1xf32>,
    %c3_92 = arith.constant 3 : index
    %c0_93 = arith.constant 0 : index
    %c0_94 = arith.constant 0 : index
    %159 = vector.load %arg17[%c3_92, %c0_93, %c0_94] : memref<4x8x1xf32, #tpu.memory_space<vmem>>, vector<1x8x1xf32>
    %160 = vector.shape_cast %159 : vector<1x8x1xf32> to vector<8x1xf32>
    %161 = vector.shape_cast %144 : vector<8x1xf32> to vector<1x8x1xf32>
    tpu.vector_store %arg17[%c3_92, %c0_93, %c0_94], %161 {strides = array<i32>} : memref<4x8x1xf32, #tpu.memory_space<vmem>>, vector<1x8x1xf32>,
    %c0_95 = arith.constant 0 : index
    %c24_96 = arith.constant 24 : index
    %162 = vector.load %arg19[%c0_95, %c24_96] : memref<8x32xf32, #tpu.memory_space<vmem>>, vector<8x8xf32>
    %163 = vector.broadcast %146 : vector<8x1xf32> to vector<8x8xf32>
    %164 = arith.mulf %163, %162 : vector<8x8xf32>
    %165 = arith.truncf %149 : vector<8x16xf32> to vector<8x16xbf16>
    %166 = vector.extract_strided_slice %20 {offsets = [0, 24], sizes = [16, 8], strides = [1, 1]} : vector<16x32xbf16> to vector<16x8xbf16>
    %cst_97 = arith.constant dense<0.000000e+00> : vector<8x8xf32>
    %167 = tpu.matmul %165, %166, %cst_97 {dimension_numbers = #tpu.dot_dimension_numbers<[1], [0], [0], [1], [0, 0, 1, 1], [], []>} : vector<8x16xbf16>, vector<16x8xbf16>, vector<8x8xf32> -> vector<8x8xf32>
    %168 = arith.addf %164, %167 : vector<8x8xf32>
    %c0_98 = arith.constant 0 : index
    %c24_99 = arith.constant 24 : index
    %169 = vector.load %arg19[%c0_98, %c24_99] : memref<8x32xf32, #tpu.memory_space<vmem>>, vector<8x8xf32>
    tpu.vector_store %arg19[%c0_98, %c24_99], %168 {strides = array<i32>} : memref<8x32xf32, #tpu.memory_space<vmem>>, vector<8x8xf32>,
    %170 = tpu.reciprocal %155 {approx = true} : vector<8x1xf32> -> vector<8x1xf32>
    %cst_100 = arith.constant 2.500000e-01 : f32
    %171 = vector.broadcast %cst_100 : f32 to vector<8x1xf32>
    %172 = arith.mulf %170, %171 : vector<8x1xf32>
    %173 = vector.broadcast %172 : vector<8x1xf32> to vector<8x16xf32>
    %174 = arith.mulf %149, %173 : vector<8x16xf32>
    %175 = arith.addf %136, %174 : vector<8x16xf32>
    %c0_101 = arith.constant 0 : index
    %c0_102 = arith.constant 0 : index
    %c0_103 = arith.constant 0 : index
    %176 = vector.load %arg15[%c0_101, %c0_102, %c0_103] : memref<1x8x16xf32, #tpu.memory_space<vmem>>, vector<1x8x16xf32>
    %177 = vector.shape_cast %176 : vector<1x8x16xf32> to vector<8x16xf32>
    %178 = vector.shape_cast %175 : vector<8x16xf32> to vector<1x8x16xf32>
    tpu.vector_store %arg15[%c0_101, %c0_102, %c0_103], %178 {strides = array<i32>} : memref<1x8x16xf32, #tpu.memory_space<vmem>>, vector<1x8x16xf32>,
    %c0_i32_104 = arith.constant 0 : i32
    %179 = arith.cmpi eq, %arg2, %c0_i32_104 : i32
    %180 = arith.extui %179 : i1 to i32
    %c0_i32_105 = arith.constant 0 : i32
    %181 = arith.cmpi ne, %180, %c0_i32_105 : i32
    scf.if %181 {
      %c0_106 = arith.constant 0 : index
      %c0_107 = arith.constant 0 : index
      %182 = vector.load %arg19[%c0_106, %c0_107] : memref<8x32xf32, #tpu.memory_space<vmem>>, vector<8x8xf32>
      %c0_108 = arith.constant 0 : index
      %c0_109 = arith.constant 0 : index
      %c0_110 = arith.constant 0 : index
      %183 = vector.load %arg18[%c0_108, %c0_109, %c0_110] : memref<4x8x1xf32, #tpu.memory_space<vmem>>, vector<1x8x1xf32>
      %184 = vector.shape_cast %183 : vector<1x8x1xf32> to vector<8x1xf32>
      %185 = tpu.reciprocal %184 {approx = true} : vector<8x1xf32> -> vector<8x1xf32>
      %186 = vector.broadcast %185 : vector<8x1xf32> to vector<8x8xf32>
      %187 = arith.mulf %182, %186 : vector<8x8xf32>
      %c0_111 = arith.constant 0 : index
      %c0_112 = arith.constant 0 : index
      %188 = vector.load %arg19[%c0_111, %c0_112] : memref<8x32xf32, #tpu.memory_space<vmem>>, vector<8x8xf32>
      tpu.vector_store %arg19[%c0_111, %c0_112], %187 {strides = array<i32>} : memref<8x32xf32, #tpu.memory_space<vmem>>, vector<8x8xf32>,
      %c0_113 = arith.constant 0 : index
      %c8_114 = arith.constant 8 : index
      %189 = vector.load %arg19[%c0_113, %c8_114] : memref<8x32xf32, #tpu.memory_space<vmem>>, vector<8x8xf32>
      %c1_115 = arith.constant 1 : index
      %c0_116 = arith.constant 0 : index
      %c0_117 = arith.constant 0 : index
      %190 = vector.load %arg18[%c1_115, %c0_116, %c0_117] : memref<4x8x1xf32, #tpu.memory_space<vmem>>, vector<1x8x1xf32>
      %191 = vector.shape_cast %190 : vector<1x8x1xf32> to vector<8x1xf32>
      %192 = tpu.reciprocal %191 {approx = true} : vector<8x1xf32> -> vector<8x1xf32>
      %193 = vector.broadcast %192 : vector<8x1xf32> to vector<8x8xf32>
      %194 = arith.mulf %189, %193 : vector<8x8xf32>
      %c0_118 = arith.constant 0 : index
      %c8_119 = arith.constant 8 : index
      %195 = vector.load %arg19[%c0_118, %c8_119] : memref<8x32xf32, #tpu.memory_space<vmem>>, vector<8x8xf32>
      tpu.vector_store %arg19[%c0_118, %c8_119], %194 {strides = array<i32>} : memref<8x32xf32, #tpu.memory_space<vmem>>, vector<8x8xf32>,
      %c0_120 = arith.constant 0 : index
      %c16_121 = arith.constant 16 : index
      %196 = vector.load %arg19[%c0_120, %c16_121] : memref<8x32xf32, #tpu.memory_space<vmem>>, vector<8x8xf32>
      %c2_122 = arith.constant 2 : index
      %c0_123 = arith.constant 0 : index
      %c0_124 = arith.constant 0 : index
      %197 = vector.load %arg18[%c2_122, %c0_123, %c0_124] : memref<4x8x1xf32, #tpu.memory_space<vmem>>, vector<1x8x1xf32>
      %198 = vector.shape_cast %197 : vector<1x8x1xf32> to vector<8x1xf32>
      %199 = tpu.reciprocal %198 {approx = true} : vector<8x1xf32> -> vector<8x1xf32>
      %200 = vector.broadcast %199 : vector<8x1xf32> to vector<8x8xf32>
      %201 = arith.mulf %196, %200 : vector<8x8xf32>
      %c0_125 = arith.constant 0 : index
      %c16_126 = arith.constant 16 : index
      %202 = vector.load %arg19[%c0_125, %c16_126] : memref<8x32xf32, #tpu.memory_space<vmem>>, vector<8x8xf32>
      tpu.vector_store %arg19[%c0_125, %c16_126], %201 {strides = array<i32>} : memref<8x32xf32, #tpu.memory_space<vmem>>, vector<8x8xf32>,
      %c0_127 = arith.constant 0 : index
      %c24_128 = arith.constant 24 : index
      %203 = vector.load %arg19[%c0_127, %c24_128] : memref<8x32xf32, #tpu.memory_space<vmem>>, vector<8x8xf32>
      %c3_129 = arith.constant 3 : index
      %c0_130 = arith.constant 0 : index
      %c0_131 = arith.constant 0 : index
      %204 = vector.load %arg18[%c3_129, %c0_130, %c0_131] : memref<4x8x1xf32, #tpu.memory_space<vmem>>, vector<1x8x1xf32>
      %205 = vector.shape_cast %204 : vector<1x8x1xf32> to vector<8x1xf32>
      %206 = tpu.reciprocal %205 {approx = true} : vector<8x1xf32> -> vector<8x1xf32>
      %207 = vector.broadcast %206 : vector<8x1xf32> to vector<8x8xf32>
      %208 = arith.mulf %203, %207 : vector<8x8xf32>
      %c0_132 = arith.constant 0 : index
      %c24_133 = arith.constant 24 : index
      %209 = vector.load %arg19[%c0_132, %c24_133] : memref<8x32xf32, #tpu.memory_space<vmem>>, vector<8x8xf32>
      tpu.vector_store %arg19[%c0_132, %c24_133], %208 {strides = array<i32>} : memref<8x32xf32, #tpu.memory_space<vmem>>, vector<8x8xf32>,
      %c0_134 = arith.constant 0 : index
      %c0_135 = arith.constant 0 : index
      %210 = vector.load %arg19[%c0_134, %c0_135] : memref<8x32xf32, #tpu.memory_space<vmem>>, vector<8x32xf32>
      %211 = arith.truncf %210 : vector<8x32xf32> to vector<8x32xbf16>
      %c0_136 = arith.constant 0 : index
      %c0_137 = arith.constant 0 : index
      %212 = vector.load %arg12[%c0_136, %c0_137] : memref<32x32xbf16, #tpu.memory_space<vmem>>, vector<32x32xbf16>
      %cst_138 = arith.constant dense<0.000000e+00> : vector<8x32xf32>
      %213 = tpu.matmul %211, %212, %cst_138 {dimension_numbers = #tpu.dot_dimension_numbers<[1], [0], [0], [1], [0, 0, 1, 1], [], []>} : vector<8x32xbf16>, vector<32x32xbf16>, vector<8x32xf32> -> vector<8x32xf32>
      %c0_139 = arith.constant 0 : index
      %c0_140 = arith.constant 0 : index
      %214 = vector.load %arg13[%c0_139, %c0_140] : memref<1x32xf32, #tpu.memory_space<vmem>>, vector<1x32xf32>
      %215 = vector.broadcast %214 : vector<1x32xf32> to vector<8x32xf32>
      %216 = arith.addf %213, %215 : vector<8x32xf32>
      %c0_141 = arith.constant 0 : index
      %c0_142 = arith.constant 0 : index
      %c0_143 = arith.constant 0 : index
      %217 = vector.load %arg14[%c0_141, %c0_142, %c0_143] : memref<1x8x32xf32, #tpu.memory_space<vmem>>, vector<1x8x32xf32>
      %218 = vector.shape_cast %217 : vector<1x8x32xf32> to vector<8x32xf32>
      %219 = vector.shape_cast %216 : vector<8x32xf32> to vector<1x8x32xf32>
      tpu.vector_store %arg14[%c0_141, %c0_142, %c0_143], %219 {strides = array<i32>} : memref<1x8x32xf32, #tpu.memory_space<vmem>>, vector<1x8x32xf32>,
    } else {
    }
    return
  }
  func.func @transform_0(%arg0: i32, %arg1: i32, %arg2: i32) -> (i32, i32, i32) {
    %c0_i32 = arith.constant 0 : i32
    %c0_i32_0 = arith.constant 0 : i32
    return %arg0, %arg1, %c0_i32 : i32, i32, i32
  }
  func.func @transform_1(%arg0: i32, %arg1: i32, %arg2: i32) -> (i32, i32, i32) {
    %c0_i32 = arith.constant 0 : i32
    %c0_i32_0 = arith.constant 0 : i32
    return %arg0, %arg2, %c0_i32 : i32, i32, i32
  }
  func.func @transform_2(%arg0: i32, %arg1: i32, %arg2: i32) -> (i32, i32, i32) {
    %c0_i32 = arith.constant 0 : i32
    %c0_i32_0 = arith.constant 0 : i32
    return %arg0, %arg2, %c0_i32 : i32, i32, i32
  }
  func.func @transform_3(%arg0: i32, %arg1: i32, %arg2: i32) -> (i32, i32) {
    %c0_i32 = arith.constant 0 : i32
    %c0_i32_0 = arith.constant 0 : i32
    %c0_i32_1 = arith.constant 0 : i32
    return %c0_i32, %c0_i32_0 : i32, i32
  }
  func.func @transform_4(%arg0: i32, %arg1: i32, %arg2: i32) -> (i32, i32) {
    %c0_i32 = arith.constant 0 : i32
    %c0_i32_0 = arith.constant 0 : i32
    %c0_i32_1 = arith.constant 0 : i32
    return %c0_i32, %c0_i32_0 : i32, i32
  }
  func.func @transform_5(%arg0: i32, %arg1: i32, %arg2: i32) -> (i32, i32) {
    %c0_i32 = arith.constant 0 : i32
    %c0_i32_0 = arith.constant 0 : i32
    %c0_i32_1 = arith.constant 0 : i32
    return %c0_i32, %c0_i32_0 : i32, i32
  }
  func.func @transform_6(%arg0: i32, %arg1: i32, %arg2: i32) -> (i32, i32) {
    %c0_i32 = arith.constant 0 : i32
    %c0_i32_0 = arith.constant 0 : i32
    %c0_i32_1 = arith.constant 0 : i32
    return %c0_i32, %c0_i32_0 : i32, i32
  }
  func.func @transform_7(%arg0: i32, %arg1: i32, %arg2: i32) -> (i32, i32) {
    %c0_i32 = arith.constant 0 : i32
    %c0_i32_0 = arith.constant 0 : i32
    %c0_i32_1 = arith.constant 0 : i32
    return %c0_i32, %c0_i32_0 : i32, i32
  }
  func.func @transform_8(%arg0: i32, %arg1: i32, %arg2: i32) -> (i32, i32) {
    %c0_i32 = arith.constant 0 : i32
    %c0_i32_0 = arith.constant 0 : i32
    %c0_i32_1 = arith.constant 0 : i32
    return %c0_i32, %c0_i32_0 : i32, i32
  }
  func.func @transform_9(%arg0: i32, %arg1: i32, %arg2: i32) -> (i32, i32) {
    %c0_i32 = arith.constant 0 : i32
    %c0_i32_0 = arith.constant 0 : i32
    %c0_i32_1 = arith.constant 0 : i32
    return %c0_i32, %c0_i32_0 : i32, i32
  }
  func.func @transform_10(%arg0: i32, %arg1: i32, %arg2: i32) -> (i32, i32) {
    %c0_i32 = arith.constant 0 : i32
    %c0_i32_0 = arith.constant 0 : i32
    %c0_i32_1 = arith.constant 0 : i32
    return %c0_i32, %c0_i32_0 : i32, i32
  }
  func.func @transform_11(%arg0: i32, %arg1: i32, %arg2: i32) -> (i32, i32, i32) {
    %c0_i32 = arith.constant 0 : i32
    %c0_i32_0 = arith.constant 0 : i32
    return %arg0, %arg1, %c0_i32 : i32, i32, i32
  }
  func.func @transform_12(%arg0: i32, %arg1: i32, %arg2: i32) -> (i32, i32, i32) {
    %c0_i32 = arith.constant 0 : i32
    %c0_i32_0 = arith.constant 0 : i32
    return %arg0, %arg1, %c0_i32 : i32, i32, i32
  }
}

</mosaic_0001>

<bundles_post_ra>
// kernel: tpu_custom_call.1
= control target key start
LH: loop header
LB: loop body
LE: loop exit
PB: predicated region body
PF: predicated region fallthrough
CT: control target
= control target key end

     0   :  { %s2480_s0 = inlined_call_operand.hbm [shape: f32[2,8,32], index: 0, kind: input, shape index: {}]   ;;  %s2481_s1 = inlined_call_operand.vmem [shape: f32[2,16,32], index: 1, kind: input, shape index: {}]   ;;  %s2482_s2 = inlined_call_operand.hbm [shape: f32[2,16,32], index: 2, kind: input, shape index: {}]   ;;  %s2483_s3 = inlined_call_operand.hbm [shape: bf16[32,32], index: 3, kind: input, shape index: {}]   ;;  %s2484_s4 = inlined_call_operand.hbm [shape: bf16[32,32], index: 4, kind: input, shape index: {}]   ;;  %s2485_s5 = inlined_call_operand.hbm [shape: bf16[32,32], index: 5, kind: input, shape index: {}]   ;;  %s2486_s6 = inlined_call_operand.vmem [shape: f32[1,32], index: 6, kind: input, shape index: {}]   ;;  %s2487_s7 = inlined_call_operand.vmem [shape: f32[32,1], index: 7, kind: input, shape index: {}]   ;;  %s2488_s8 = inlined_call_operand.vmem [shape: f32[1,32], index: 8, kind: input, shape index: {}]   ;;  %s2489_s9 = inlined_call_operand.hbm [shape: bf16[32,32], index: 9, kind: input, shape index: {}]   ;;  %s2490_s10 = inlined_call_operand.vmem [shape: f32[1,32], index: 10, kind: input, shape index: {}]   ;;  %s2491_s11 = inlined_call_operand.hbm [shape: f32[2,8,32], index: 11, kind: output, shape index: {0}]   ;;  %s2492_s12 = inlined_call_operand.hbm [shape: f32[2,8,16], index: 12, kind: output, shape index: {1}]  }
   0x1   :  { %2498 = sst [smem:[#allocation32_spill]] %s2480_s0 }
   0x2   :  { %2499 = sst [smem:[#allocation33_spill]] %s2483_s3 }
   0x3   :  { %2500 = sst [smem:[#allocation34_spill]] %s2484_s4 }
   0x4   :  { %2501 = sst [smem:[#allocation35_spill]] %s2485_s5 }
   0x5   :  { %2502 = sst [smem:[#allocation36_spill]] %s2489_s9 }
   0x6   :  { %2503 = sst [smem:[#allocation37_spill]] %s2490_s10 }
   0x7   :  { %2504 = sst [smem:[#allocation38_spill]] %s2491_s11 }
   0x8   :  { %18 = vsyncpa [#allocation7], 0 }
   0x9   :  { %20 = vsyncpa [#allocation7 + $0x1], 0 }
   0xa   :  { %21 = vsyncpa [#allocation10], 0 }
   0xb   :  { %23 = vsyncpa [#allocation10 + $0x1], 0 }
   0xc   :  { %24 = vsyncpa [#allocation13], 0 }
   0xd   :  { %25 = vsyncpa [#allocation16], 0 }
   0xe   :  { %26 = vsyncpa [#allocation8], 0 }
   0xf   :  { %28 = vsyncpa [#allocation8 + $0x1], 0 }
  0x10   :  { %29 = vsyncpa [#allocation19], 0 }
  0x11   :  { %31 = vsyncpa [#allocation19 + $0x1], 0  ;;  %s2122_s21 = smov 0   ;;  %s2124_s22 = smov 0  }
  0x12   :  { %s2126_s23 = smov 0   ;;  %s2128_s24 = smov 0  }
  0x13   :  { %s2130_s25 = smov 0   ;;  %s2132_s26 = smov 0  }
  0x14 LB: > { %2505 = sst [smem:[#allocation27_spill]] %s2018_s21  ;;  %s2153_s27 = sadd.s32 4294967295, %s2038_s26   ;;  %s2038_s26 = sphi %s2132_s26, %s37_s26   ;;  %s2034_s25 = sphi %s2130_s25, %s2532_s25   ;;  %s2030_s24 = sphi %s2128_s24, %s2531_s24   ;;  %s2026_s23 = sphi %s2126_s23, %s2527_s23   ;;  %s2022_s22 = sphi %s2124_s22, %s2530_s22   ;;  %s2018_s21 = sphi %s2122_s21, %s2529_s21  }
  0x15   : > { %2506 = sst [smem:[#allocation28_spill]] %s2026_s23  ;;  %p1481_p0 = scmp.ge.s32.totalorder %s2038_s26, 1 }
  0x16   : > { %p79_p1 = scmp.eq.s32.totalorder %s2153_s27, 0  ;;  %p369_p2 = scmp.lt.s32.totalorder %s2038_s26, 3 }
  0x17   : > { %s2507_s3 = sld [smem:[#allocation33_spill]]  ;;  %s2040_s14 = smov [#allocation11]  }
  0x18   : > { %p2161_p3 = pnand %p1481_p0, %p369_p2  ;;  %s382_s15 = sshll.u32 %s2040_s14, 4  ;;  %s383_s15 = int_to_ptr.vmem [resolvable:$true] %s382_s15 }
  0x19   : > { %p1486_p6 = scmp.ge.s32.totalorder %s2038_s26, 2  ;;  %s2510_s4 = sld [smem:[#allocation34_spill]] }
  0x1a   : > { %p1588_p4 = pneg %p2161_p3  ;;  %s2041_s20 = smov 64  }
  0x1b   : > { %s2042_s28 = smov 4   ;;  %s2043_s29 = smov [#allocation12]  }
  0x1c   : > { %p2169_p5 = pnand %p1588_p4, %p79_p1  ;;  %s396_s14 = sshll.u32 %s2043_s29, 4  ;;  %s397_s14 = int_to_ptr.vmem [resolvable:$true] %s396_s14 }
  0x1d   : > { %s380_s30 = sshll.u32 %s2507_s3, 4  ;;  %s2511_s5 = sld [smem:[#allocation35_spill]]  ;;  %s381_s30 = int_to_ptr.hbm [resolvable:$true] %s380_s30 }
  0x1e   : > { %1591 = dma.hbm_to_vmem [thread:$0]  (!%p2169_p5), %s381_s30, 256, %s383_s15, [#allocation10], %s2041_s20, %s2041_s20, %s2042_s28  }
  0x1f   : > { %s394_s19 = sshll.u32 %s2510_s4, 4  ;;  %s2512_s9 = sld [smem:[#allocation36_spill]]  ;;  %s395_s19 = int_to_ptr.hbm [resolvable:$true] %s394_s19 }
  0x20   : > { %1594 = dma.hbm_to_vmem [thread:$0]  (!%p2169_p5), %s395_s19, 256, %s397_s14, [#allocation13], %s2041_s20, %s2041_s20, %s2042_s28  }
  0x21   : > { %s2044_s15 = smov [#allocation14]   ;;  %s2045_s3 = smov [#allocation15]  }
  0x22   : > { %s410_s4 = sshll.u32 %s2044_s15, 4  ;;  %s433_s10 = sshll.u32 %s2045_s3, 4  ;;  %s411_s4 = int_to_ptr.vmem [resolvable:$true] %s410_s4  ;;  %s434_s10 = int_to_ptr.vmem [resolvable:$true] %s433_s10 }
  0x23   : > { %s408_s11 = sshll.u32 %s2511_s5, 4  ;;  %s1480_s19 = sadd.s32 4294967294, %s2038_s26   ;;  %s409_s11 = int_to_ptr.hbm [resolvable:$true] %s408_s11 }
  0x24   : > { %1597 = dma.hbm_to_vmem [thread:$0]  (!%p2169_p5), %s409_s11, 256, %s411_s4, [#allocation13], %s2041_s20, %s2041_s20, %s2042_s28  }
  0x25   : > { %s431_s30 = sshll.u32 %s2512_s9, 4  ;;  %s56_s29 = sadd.s32 1, %s2034_s25  ;;  %s432_s30 = int_to_ptr.hbm [resolvable:$true] %s431_s30 }
  0x26   : > { %1600 = dma.hbm_to_vmem [thread:$0]  (!%p2169_p5), %s432_s30, 256, %s434_s10, [#allocation16], %s2041_s20, %s2041_s20, %s2042_s28  }
  0x27   : > { %p58_p7 = scmp.ge.s32.totalorder %s56_s29, 2  ;;  %s65_s14 = sadd.s32 1, %s2026_s23 }
  0x28   : > { %p72_p8 = scmp.ne.s32.totalorder %s2026_s23, %s2022_s22  ;;  %p73_p9 = scmp.eq.s32.totalorder %s2038_s26, 0 }
  0x29   : > { %s2534_s29 = smov (%p58_p7, %s56_s29), 0  ;;  %p78_p11 = scmp.ne.s32.totalorder %s2022_s22, %s2018_s21 }
  0x2a   : > { %2513 = sst [smem:[#allocation29_spill]] %s2534_s29  ;;  %p2199_p10 = por %p73_p9, %p72_p8 }
  0x2b   : > { %s60_s11 = ssub.s32 %s2034_s25, %s2534_s29  ;;  %p328_p12 = scmp.eq.s32.totalorder %s2153_s27, 1 }
  0x2c   : > { %p63_p13 = scmp.eq.s32.totalorder %s60_s11, 0  ;;  %p2210_p0 = por %p79_p1, %p78_p11 }
  0x2d   : > { %p2214_p2 = por %p328_p12, %p72_p8  ;;  %p334_p4 = scmp.eq.s32.totalorder %s1480_s19, 1 }
  0x2e   : > { %s2219_s28 = scalar_select %p63_p13, %s2026_s23, %s65_s14  }
  0x2f   : > { %p2221_p5 = por %p334_p4, %p78_p11  ;;  %p1619_p7 = scmp.lt.s32.totalorder %s2038_s26, 2 }
  0x30   : > { %2517 = sst [smem:[#allocation30_spill]] %s2219_s28  ;;  %s450_s18 = sand.u32 1, %s2026_s23  }
  0x31   : > { %s2518_s17 = scalar_select %p2221_p5, 1, 0 }
  0x32   : > { %s1488_s30 = sshll.u32 %s2034_s25, 3  ;;  %s1487_s15 = sshll.u32 %s450_s18, 3 }
  0x33   : > { %2519 = sst [smem:[#allocation31_spill]] %s2518_s17  ;;  %s454_s9 = scalar_lea.vmem [#allocation6], %s1487_s15 }
  0x34   : > { %s2520_s0 = sld [smem:[#allocation32_spill]]  ;;  %s463_s29 = sshll.u32 %s454_s9, 4  ;;  %s464_s29 = int_to_ptr.vmem [resolvable:$true] %s463_s29 }
  0x35   : > { %p2233_p8 = pnand %p1619_p7, %p2199_p10  ;;  %s1489_s14 = sshll.u32 %s450_s18, 4 }
  0x36   : > { %s1554_s28 = sshll.u32 %s2034_s25, 4  ;;  %s487_s23 = scalar_lea.vmem [#allocation9], %s1489_s14 }
  0x37   : > { %s497_s17 = sshll.u32 %s487_s23, 4  ;;  %s451_s21 = scalar_lea.sflag [#allocation7], %s450_s18  ;;  %s498_s17 = int_to_ptr.vmem [resolvable:$true] %s497_s17 }
  0x38   : > { %s494_s3 = scalar_lea.hbm %s2482_s2, %s1554_s28  ;;  %s2249_s23 = sand.u32 (!%p2161_p3), 1, %s2022_s22  }
  0x39   : > { %s495_s4 = sshll.u32 %s494_s3, 4  ;;  %s496_s4 = int_to_ptr.hbm [resolvable:$true] %s495_s4 }
  0x3a   : > { %s459_s11 = scalar_lea.hbm %s2520_s0, %s1488_s30  ;;  %s483_s30 = sand.u32 1, %s2038_s26  }
  0x3b   : > { %s461_s5 = sshll.u32 %s459_s11, 4  ;;  %s484_s10 = scalar_lea.sflag [#allocation10], %s483_s30  ;;  %s462_s5 = int_to_ptr.hbm [resolvable:$true] %s461_s5 }
  0x3c   : > { %1604 = dma.hbm_to_vmem [thread:$0]  (!%p2233_p8), %s462_s5, 128, %s464_s29, %s451_s21  }
  0x3d   : > { %s2046_s11 = smov 128   ;;  %s2047_s0 = smov 8  }
  0x3e   : > { %1607 = dma.hbm_to_vmem [thread:$0]  (!%p2233_p8), %s496_s4, 256, %s498_s17, %s484_s10, %s2046_s11, %s2046_s11, %s2047_s0  }
  0x3f   : > { %509 = sbr.rel (%p2161_p3) target bundleno = 1448 (0x5a8), region = 64  ;;  %s2252_s5 = sshll.u32 (!%p2161_p3), %s2249_s23, 3 }
  0x40   : > { %s512_s21 = scalar_lea.sflag (!%p2161_p3), [#allocation7], %s2249_s23  ;;  %s515_s29 = scalar_lea.vmem (!%p2161_p3), [#allocation6], %s2252_s5 }
  0x44   : > { %1989 = dma.done.wait (%p2210_p0), %s512_s21, 128  }
  0x45   : > { %1991 = vsyncadd (%p2210_p0), %s512_s21, 4294967168  ;;  %s521_s0 = sand.u32 1, %s2153_s27   ;;  %s1494_s13 = sshll.u32 %s2249_s23, 4 }
  0x46   : > { %s522_s28 = scalar_lea.sflag [#allocation10], %s521_s0  ;;  %s2262_s17 = scalar_lea.vmem [#allocation9], %s1494_s13 }
  0x47   : > { %1993 = dma.done.wait (%p2210_p0), %s522_s28, 256  }
  0x48   : > { %1995 = vsyncadd (%p2210_p0), %s522_s28, 4294967040 }
  0x49   : > { %1997 = dma.done.wait (%p79_p1), [#allocation10], 256  }
  0x4a   : > { %1999 = vsyncadd (%p79_p1), [#allocation10], 4294967040 }
  0x4b   : > { %2001 = dma.done.wait (%p79_p1), [#allocation13], 512  }
  0x4c   : > { %2003 = vsyncadd (%p79_p1), [#allocation13], 4294966784 }
  0x4d   : > { %2005 = dma.done.wait (%p79_p1), [#allocation16], 256  }
  0x4e   : > { %2007 = vsyncadd (%p79_p1), [#allocation16], 4294967040  ;;  %p607_p3 = scmp.lt.s32.totalorder %s2030_s24, 1  ;;  %v2048_v0 = vmov 0   ;;  %v1557_v1 = vld [vmem:[#allocation11 + $0x8] sm:$0xff]  ;;  %vm644_vm0 = vcmask 261120  }
  0x4f   : > { %1690 = vset.pattern.permute.xlu0 %v2048_v0  ;;  %1691 = vset.pattern.permute.xlu1 %v2048_v0  ;;  %v1556_v5 = vld [vmem:[#allocation11] sm:$0xff]  ;;  %v622_v6 = vld [vmem:[%s515_s29] sm:$0xff]  ;;  %vm662_vm1 = vcmask 257024   ;;  %vm795_vm2 = vcmask 1043456   ;;  %vm791_vm3 = vcmask 64512   ;;  %s2049_s4 = smov 120  }
  0x50   : > { %s608_s16 = scalar_select %p607_p3, %s2030_s24, 1  ;;  %1692 = vset.pattern.permute.xlu2 %v2048_v0  ;;  %654 = vmatpush.bf16.msra.mxu0 %v1557_v1  ;;  %v684_v7 = vld [vmem:[%s2487_s7] sm:$0xff]  ;;  %v623_v9 = vpack.c.bf16 %v622_v6, %v622_v6  ;;  %v1558_v10 = vld [vmem:[#allocation12] sm:$0xff]  ;;  %vm664_vm4 = vcmask 7168   ;;  %v1559_v26 = vld [vmem:[#allocation12 + $0x8] sm:$0xff]  ;;  %v2050_v27 = vmov -inf  }
  0x51   : > { %690 = vperm.xlu0 %1690, %v684_v7   ;;  %v1693_v11 = vld [vmem:[%s2486_s6] ss:$0 sm:$0xff]  ;;  %v1561_v25 = vld [vmem:[#allocation14 + $0x8] sm:$0xff]  ;;  %665 = vst.msk [vmem:[#allocation3] sm:$0xff] %vm664_vm4, %v2050_v27  ;;  %vm813_vm5 = vcmask 130048   ;;  %v2051_v35 = vmov 0.0  }
  0x52   : > { %s1555_s18 = sshll.u32 %s608_s16, 4  ;;  %776 = vmatpush.bf16.msra.mxu2 %v1561_v25  ;;  %v1560_v28 = vld [vmem:[#allocation14] sm:$0xff]  ;;  %v678_v30 = vld [vmem:[%s2262_s17 + $0x8] sm:$0xff]  ;;  %666 = vst.msk [vmem:[#allocation3 + $0x8] sm:$0xff] %vm664_vm4, %v2050_v27  ;;  %s2052_s16 = smov 112   ;;  %vm961_vm6 = vcmask 130112  }
  0x53   : > { %s614_s30 = scalar_lea.vmem %s2481_s1, %s1555_s18  ;;  %v677_v29 = vld [vmem:[%s2262_s17] sm:$0xff]  ;;  %667 = vst.msk [vmem:[#allocation3 + $0x10] sm:$0xff] %vm664_vm4, %v2050_v27  ;;  %s2053_s18 = smov 104   ;;  %vm1055_vm7 = vcmask 195712   ;;  %vm1149_vm8 = vcmask 261312  }
  0x54   : > { %v674_v2 = vld [vmem:[%s614_s30] sm:$0xff]  ;;  %v675_v3 = vld [vmem:[%s614_s30 + $0x8] sm:$0xff]  ;;  %655 = vmatpush.bf16.msra.mxu0 %v1556_v5  ;;  %668 = vst.msk [vmem:[#allocation3 + $0x18] sm:$0xff] %vm664_vm4, %v2050_v27  ;;  %v679_v31 = vpack.c.bf16 %v678_v30, %v677_v29  ;;  %v686_v36 = vld [vmem:[%s2487_s7 + $0x10] sm:$0xff]  ;;  %s2054_s19 = smov 8   ;;  %s2055_s14 = smov 16  }
  0x55   : > { %v676_v4 = vpack.c.bf16 %v675_v3, %v674_v2  ;;  %673 = vst.msk [vmem:[#allocation5] sm:$0xff] %vm644_vm0, %v2051_v35  ;;  %v687_v37 = vld [vmem:[%s2487_s7 + $0x18] sm:$0xff]  ;;  %v1694_v39 = vld [vmem:[%s2488_s8] ss:$0 sm:$0xff]  ;;  %v685_v47 = vld [vmem:[%s2487_s7 + $0x8] sm:$0xff]  ;;  %s2056_s30 = smov 24  }
  0x56   : > { %777 = vmatpush.bf16.msra.mxu2 %v1560_v28  ;;  %669 = vst.msk [vmem:[#allocation4] sm:$0xff] %vm664_vm4, %v2051_v35  ;;  %s605_s27 = scalar_lea.vmem [#allocation18], %s2252_s5  ;;  %s1550_s15 = sshll.u32 %s2030_s24, 3 }
  0x57   : > { %v726_v8 = vsel %vm644_vm0, %v676_v4, 0  ;;  %1511 = vmatmul.msk.bf16.vlgmr.msra.gmra.mxu0 %vm644_vm0, %v623_v9  ;;  %670 = vst.msk [vmem:[#allocation4 + $0x8] sm:$0xff] %vm664_vm4, %v2051_v35  ;;  %s1277_s10 = sshll.u32 %s605_s27, 4  ;;  %s1249_s21 = scalar_lea.sflag [#allocation19], %s2249_s23  ;;  %s1278_s10 = int_to_ptr.vmem [resolvable:$true] %s1277_s10 }
  0x58   : > { %735 = vmatpush.bf16.xpose.msra.mxu1 %v726_v8  ;;  %671 = vst.msk [vmem:[#allocation4 + $0x10] sm:$0xff] %vm664_vm4, %v2051_v35  ;;  %v2317_v38 = vld [vmem:[#allocation3] sm:$0xff]  ;;  %s1928_s24 = scalar_lea.hbm %s2492_s12, 16 }
  0x59   : > { %1530 = vmatmul.msk.bf16.vlgmr.msra.gmra.mxu2 %vm644_vm0, %v679_v31  ;;  %672 = vst.msk [vmem:[#allocation4 + $0x18] sm:$0xff] %vm664_vm4, %v2051_v35  ;;  %v904_v31 = vld [vmem:[#allocation3 + $0x8] sm:$0xff] }
  0x5b   : > { %v2366_v35 = vld [vmem:[#allocation3 + $0x18] sm:$0xff] }
  0x5f   : > { %1520 = vmatmul.msk.bf16.vlgmr.msra.gmra.mxu1 %vm644_vm0, %v1558_v10 }
  0x6f   : > { %1521 = vmatmul.msk.bf16.gmra.mxu1 %vm644_vm0, %v1559_v26 }
  0xc3   : > { %v691_v13 = vpop.permute.xlu0 %690 }
  0xd4   : > { %v657_v12 = vpop.f32.mrf.mxu0 }
  0xd5   : > { %v658_v14 = vadd.f32 %v1693_v11, %v657_v12 }
  0xd7   : > { %v661_v16 = vpack.c.bf16 %v658_v14, %v658_v14 }
  0xd9   : > { %663 = vst.msk [vmem:[#allocation2] sm:$0xf] %vm662_vm1, %v661_v16 }
  0xdc   : > { %v737_v15 = vpop.f32.mrf.mxu1  ;;  %v659_v20 = vpop.f32.mrf.mxu0 }
  0xdd   : > { %v738_v17 = vadd.f32 %v737_v15, %v691_v13  ;;  %v779_v40 = vpop.f32.mrf.mxu2 }
  0xde   : > { %v780_v43 = vadd.f32 %v1694_v39, %v779_v40 }
  0xdf   : > { %v784_v18 = vpack.c.bf16 %v738_v17, %v738_v17 }
  0xe0   : > { %v790_v21 = vld [vmem:[#allocation2] sm:$0xf]  ;;  %v788_v45 = vpack.c.bf16 %v780_v43, %v780_v43 }
  0xe1   : > { %v797_v19 = vsel %vm795_vm2, %v784_v18, 0  ;;  %v878_v22 = vld [vmem:[#allocation2] sm:$0xf] }
  0xe2   : > { %806 = vmatpush.bf16.msra.mxu3 %v797_v19  ;;  %v880_v23 = vunpack.c.l.b16 %v878_v22  ;;  %v972_v49 = vld [vmem:[#allocation2] sm:$0xf]  ;;  %v848_v50 = vunpack.c.l.b16 %v788_v45  ;;  %v838_v45 = vld [vmem:[#allocation5] sm:$0xff] }
  0xe3   : > { %v974_v53 = vunpack.c.l.b16 %v972_v49  ;;  %v1066_v56 = vld [vmem:[#allocation2] sm:$0xf] }
  0xe4   : > { %v881_v24 = vpack.c.b16 %v880_v23, %v880_v23  ;;  %v1068_v57 = vunpack.c.l.b16 %v1066_v56  ;;  %v739_v59 = vpop.f32.mrf.mxu1 }
  0xe5   : > { %1531 = vmatmul.msk.bf16.vlgmr.msra.gmra.mxu3 %vm791_vm3, %v790_v21  ;;  %v781_v46 = vpop.f32.mrf.mxu2  ;;  %v975_v55 = vpack.c.b16 %v974_v53, %v974_v53 }
  0xe6   : > { %882 = vrot.lane.b32.xlu2 %v881_v24, %s2049_s4  ;;  %v782_v48 = vadd.f32 %v1694_v39, %v781_v46  ;;  %v1069_v58 = vpack.c.b16 %v1068_v57, %v1068_v57 }
  0xe8   : > { %v789_v51 = vpack.c.bf16 %v782_v48, %v782_v48 }
  0xea   : > { %v849_v52 = vunpack.c.l.b16 %v789_v51 }
  0xec   : > { %v2333_v54 = vpack.c.b16 %v849_v52, %v848_v50  ;;  %v742_v61 = vpop.f32.mrf.mxu1 }
  0xee   : > { %700 = vperm.xlu2 %1692, %v686_v36   ;;  %862 = vmatpush.bf16.msrb.mxu3 %v2333_v54 }
  0xf4   : > { %v744_v2 = vpop.f32.mrf.mxu1 }
  0xf6   : > { %705 = vperm.xlu2 %1692, %v687_v37  }
 0x140   : > { %v883_v60 = vpop.permute.xlu2 %882 }
 0x148   : > { %v701_v62 = vpop.permute.xlu2 %700 }
 0x149   : > { %v743_v63 = vadd.f32 %v742_v61, %v701_v62 }
 0x14b   : > { %v786_v0 = vpack.c.bf16 %v743_v63, %v743_v63 }
 0x14d   : > { %v982_v1 = vsel %vm795_vm2, %v786_v0, 0 }
 0x14e   : > { %991 = vmatpush.bf16.msra.mxu3 %v982_v1 }
 0x150   : > { %v706_v3 = vpop.permute.xlu2 %705 }
 0x151   : > { %v745_v4 = vadd.f32 %v744_v2, %v706_v3 }
 0x153   : > { %v787_v5 = vpack.c.bf16 %v745_v4, %v745_v4 }
 0x155   : > { %v1076_v6 = vsel %vm795_vm2, %v787_v5, 0 }
 0x156   : > { %1085 = vmatpush.bf16.msrb.mxu1 %v1076_v6 }
 0x168   : > { %v808_v32 = vpop.f32.mrf.mxu3 }
 0x169   : > { %v814_v33 = vsel %vm813_vm5, %v808_v32, -inf }
 0x16a   : > { %815 = vmax.xlane.f32.xlu0 %v814_v33 }
 0x170   : > { %v810_v34 = vpop.f32.mrf.mxu3 }
 0x1dd   : > { %v816_v41 = vpop.xlane.xlu0 %815 }
 0x1de   : > { %v2323_v42 = vmax.f32 %v2317_v38, %v816_v41  ;;  %v998_v41 = vld [vmem:[#allocation3 + $0x10] sm:$0xff] }
 0x1e0   : > { %v818_v44 = vsub.f32 %v2317_v38, %v2323_v42  ;;  %837 = vst.msk [vmem:[#allocation3] sm:$0xff] %vm664_vm4, %v2323_v42  ;;  %823 = vperm.xlu1 %1691, %v2323_v42  }
 0x1e2   : > { %v819_v29 = vmul.f32 1.442695, %v818_v44 }
 0x1e8   : > { %695 = vperm.xlu1 %1691, %v685_v47  }
 0x1f0   : > { %976 = vrot.lane.b32.xlu1 %v975_v55, %s2052_s16 }
 0x1f8   : > { %1070 = vrot.lane.b32.xlu1 %v1069_v58, %s2053_s18 }
 0x252   : > { %v824_v7 = vpop.permute.xlu1 %823 }
 0x253   : > { %v826_v8 = vsub.f32 %v808_v32, %v824_v7 }
 0x255   : > { %v827_v9 = vmul.f32 1.442695, %v826_v8 }
 0x257   : > { %1696 = vpow2.f32 %v827_v9  ;;  %v829_v9 = vld [vmem:[#allocation4] sm:$0xff] }
 0x258   : > { %1698 = vpow2.f32 %v819_v29 }
 0x25a   : > { %v696_v10 = vpop.permute.xlu1 %695 }
 0x25b   : > { %v740_v11 = vadd.f32 %v739_v59, %v696_v10 }
 0x25d   : > { %v2340_v12 = vpop.eup %1696  ;;  %v785_v13 = vpack.c.bf16 %v740_v11, %v740_v11 }
 0x25e   : > { %v845_v14 = vpack.c.bf16 %v2340_v12, %v2340_v12  ;;  %v2362_v30 = vpop.eup %1698  ;;  %v831_v49 = vsel %vm813_vm5, %v2340_v12, 0.0 }
 0x25f   : > { %v888_v15 = vsel %vm795_vm2, %v785_v13, 0  ;;  %v830_v10 = vmul.f32 %v2362_v30, %v829_v9 }
 0x260   : > { %1532 = vmatmul.msk.bf16.vlgmr.msrb.gmra.mxu3 %vm813_vm5, %v845_v14  ;;  %897 = vmatpush.bf16.msrb.mxu0 %v888_v15  ;;  %v921_v15 = vld [vmem:[#allocation4 + $0x8] sm:$0xff] }
 0x262   : > { %v977_v16 = vpop.permute.xlu1 %976 }
 0x263   : > { %1533 = vmatmul.msk.bf16.vlgmr.msrb.gmra.mxu0 %vm791_vm3, %v883_v60 }
 0x26a   : > { %v1071_v17 = vpop.permute.xlu1 %1070 }
 0x26b   : > { %1537 = vmatmul.msk.bf16.vlgmr.msrb.gmra.mxu1 %vm791_vm3, %v1071_v17 }
 0x270   : > { %1535 = vmatmul.msk.bf16.vlgmr.msra.gmra.mxu3 %vm791_vm3, %v977_v16 }
 0x2e0   : > { %v899_v18 = vpop.f32.mrf.mxu0 }
 0x2e1   : > { %v905_v19 = vsel %vm813_vm5, %v899_v18, -inf }
 0x2e2   : > { %906 = vmax.xlane.f32.xlu2 %v905_v19 }
 0x2e3   : > { %v864_v20 = vpop.f32.mrf.mxu3 }
 0x2e8   : > { %v901_v21 = vpop.f32.mrf.mxu0  ;;  %v1087_v22 = vpop.f32.mrf.mxu1 }
 0x2e9   : > { %v1093_v23 = vsel %vm813_vm5, %v1087_v22, -inf }
 0x2ea   : > { %1094 = vmax.xlane.f32.xlu0 %v1093_v23 }
 0x2eb   : > { %v866_v24 = vpop.f32.mrf.mxu3 }
 0x2ec   : > { %v1015_v24 = vld [vmem:[#allocation4 + $0x10] sm:$0xff] }
 0x2f0   : > { %v1089_v25 = vpop.f32.mrf.mxu1 }
 0x2f3   : > { %v2351_v26 = vpop.f32.mrf.mxu3 }
 0x2f4   : > { %v999_v27 = vsel %vm813_vm5, %v2351_v26, -inf }
 0x2f5   : > { %1000 = vmax.xlane.f32.xlu1 %v999_v27 }
 0x2fa   : > { %937 = vrot.lane.b32.xlu2 %v2333_v54, %s2049_s4  ;;  %s1275_s4 = scalar_lea.hbm %s2492_s12, %s1550_s15 }
 0x2fb   : > { %v995_v28 = vpop.f32.mrf.mxu3  ;;  %s1279_s11 = sshll.u32 %s1275_s4, 4  ;;  %s1280_s11 = int_to_ptr.hbm [resolvable:$true] %s1279_s11 }
 0x2fc   : > { %s1922_s29 = sshra.s32 %s1280_s11, 4  ;;  %s1923_s29 = int_to_ptr.hbm [resolvable:$true] %s1922_s29 }
 0x2fd   : > { %s1924_s0 = scalar_lea.hbm %s1923_s29, 8  ;;  %p1929_p11 = scmp.lt.s32.totalorder %s1923_s29, %s2492_s12 }
 0x2fe   : > { %p1925_p1 = scmp.ne.s32.totalorder %s1923_s29, %s1924_s0  ;;  %p1930_p12 = scmp.lt.s32.totalorder %s1928_s24, %s1924_s0 }
 0x300   : > { %p1926_p9 = pnand %p1925_p1, %p2214_p2  ;;  %p1931_p13 = por %p1930_p12, %p1929_p11 }
 0x302   : > { %1125 = vrot.lane.b32.xlu2 %v2333_v54, %s2053_s18  ;;  %p1927_p10 = pneg %p1926_p9 }
 0x304   : > { %p1932_p0 = pnand %p1931_p13, %p1927_p10 }
 0x30a   : > { %841 = vperm.xlu2 %1692, %v2362_v30  }
 0x355   : > { %v907_v32 = vpop.xlane.xlu2 %906 }
 0x356   : > { %v908_v33 = vmax.f32 %v904_v31, %v907_v32 }
 0x358   : > { %v909_v34 = vsub.f32 %v904_v31, %v908_v33  ;;  %928 = vst.msk [vmem:[#allocation3 + $0x8] sm:$0xff] %vm664_vm4, %v908_v33  ;;  %914 = vperm.xlu0 %1690, %v908_v33  }
 0x35a   : > { %v910_v50 = vmul.f32 1.442695, %v909_v34 }
 0x35c   : > { %1700 = vpow2.f32 %v910_v50 }
 0x35d   : > { %v938_v36 = vpop.permute.xlu2 %937  ;;  %v1095_v37 = vpop.xlane.xlu0 %1094 }
 0x35e   : > { %v2369_v38 = vmax.f32 %v2366_v35, %v1095_v37  ;;  %950 = vmatpush.bf16.msrb.mxu2 %v938_v36 }
 0x360   : > { %v1097_v39 = vsub.f32 %v2366_v35, %v2369_v38  ;;  %1116 = vst.msk [vmem:[#allocation3 + $0x18] sm:$0xff] %vm664_vm4, %v2369_v38  ;;  %1102 = vperm.xlu0 %1690, %v2369_v38  }
 0x362   : > { %v1701_v51 = vpop.eup %1700  ;;  %v1098_v14 = vmul.f32 1.442695, %v1097_v39 }
 0x363   : > { %v922_v16 = vmul.f32 %v1701_v51, %v921_v15 }
 0x365   : > { %v1126_v40 = vpop.permute.xlu2 %1125 }
 0x366   : > { %1138 = vmatpush.bf16.msra.mxu2 %v1126_v40 }
 0x368   : > { %1031 = vrot.lane.b32.xlu0 %v2333_v54, %s2052_s16  ;;  %v1001_v42 = vpop.xlane.xlu1 %1000 }
 0x369   : > { %v1002_v43 = vmax.f32 %v998_v41, %v1001_v42 }
 0x36b   : > { %v1003_v44 = vsub.f32 %v998_v41, %v1002_v43  ;;  %1022 = vst.msk [vmem:[#allocation3 + $0x10] sm:$0xff] %vm664_vm4, %v1002_v43  ;;  %1008 = vperm.xlu1 %1691, %v1002_v43  }
 0x36d   : > { %v842_v46 = vpop.permute.xlu2 %841  ;;  %v1004_v7 = vmul.f32 1.442695, %v1003_v44 }
 0x36e   : > { %v844_v47 = vmul.f32 %v842_v46, %v838_v45 }
 0x370   : > { %v868_v48 = vadd.f32 %v864_v20, %v844_v47  ;;  %v1109_v20 = vld [vmem:[#allocation4 + $0x18] sm:$0xff] }
 0x372   : > { %869 = vst.msk [vmem:[#allocation5] sm:$0xff] %vm791_vm3, %v868_v48 }
 0x392   : > { %832 = vadd.xlane.f32.xlu0 %v831_v49 }
 0x3a6   : > { %932 = vperm.xlu0 %1690, %v1701_v51   ;;  %v929_v51 = vld [vmem:[#allocation5] sm:$0xff] }
 0x3ca   : > { %v915_v52 = vpop.permute.xlu0 %914 }
 0x3cb   : > { %v917_v53 = vsub.f32 %v899_v18, %v915_v52 }
 0x3cd   : > { %v918_v54 = vmul.f32 1.442695, %v917_v53 }
 0x3cf   : > { %1702 = vpow2.f32 %v918_v54 }
 0x3d2   : > { %v1103_v55 = vpop.permute.xlu0 %1102 }
 0x3d3   : > { %v1105_v56 = vsub.f32 %v1087_v22, %v1103_v55 }
 0x3d5   : > { %v2382_v57 = vpop.eup %1702  ;;  %v1106_v58 = vmul.f32 1.442695, %v1105_v56 }
 0x3d6   : > { %v923_v59 = vsel %vm813_vm5, %v2382_v57, 0.0  ;;  %v936_v60 = vpack.c.bf16 %v2382_v57, %v2382_v57 }
 0x3d7   : > { %1704 = vpow2.f32 %v1106_v58  ;;  %924 = vadd.xlane.f32.xlu1 %v923_v59 }
 0x3d8   : > { %1534 = vmatmul.msk.bf16.vlgmr.msrb.gmra.mxu2 %vm813_vm5, %v936_v60 }
 0x3da   : > { %v1032_v61 = vpop.permute.xlu0 %1031 }
 0x3db   : > { %1044 = vmatpush.bf16.msra.mxu0 %v1032_v61 }
 0x3dd   : > { %v2389_v62 = vpop.eup %1704  ;;  %v1009_v63 = vpop.permute.xlu1 %1008 }
 0x3de   : > { %v1011_v0 = vsub.f32 %v2351_v26, %v1009_v63  ;;  %v1111_v1 = vsel %vm813_vm5, %v2389_v62, 0.0  ;;  %v1124_v3 = vpack.c.bf16 %v2389_v62, %v2389_v62 }
 0x3df   : > { %1112 = vadd.xlane.f32.xlu2 %v1111_v1 }
 0x3e0   : > { %v1012_v2 = vmul.f32 1.442695, %v1011_v0 }
 0x3e2   : > { %1706 = vpow2.f32 %v1012_v2 }
 0x3e3   : > { %1708 = vpow2.f32 %v1004_v7 }
 0x3e4   : > { %1710 = vpow2.f32 %v1098_v14 }
 0x3e8   : > { %v2396_v4 = vpop.eup %1706  ;;  %1538 = vmatmul.msk.bf16.vlgmr.msra.gmra.mxu2 %vm813_vm5, %v1124_v3 }
 0x3e9   : > { %v1017_v5 = vsel %vm813_vm5, %v2396_v4, 0.0  ;;  %v1030_v6 = vpack.c.bf16 %v2396_v4, %v2396_v4  ;;  %v1709_v8 = vpop.eup %1708 }
 0x3ea   : > { %1018 = vadd.xlane.f32.xlu2 %v1017_v5  ;;  %v1711_v19 = vpop.eup %1710  ;;  %v1016_v26 = vmul.f32 %v1709_v8, %v1015_v24 }
 0x3eb   : > { %1536 = vmatmul.msk.bf16.vlgmr.msra.gmra.mxu0 %vm813_vm5, %v1030_v6  ;;  %v1110_v21 = vmul.f32 %v1711_v19, %v1109_v20 }
 0x402   : > { %1026 = vperm.xlu2 %1692, %v1709_v8  }
 0x405   : > { %v833_v11 = vpop.xlane.xlu0 %832 }
 0x406   : > { %v834_v13 = vadd.f32 %v833_v11, %v830_v10  ;;  %v1563_v10 = vld [vmem:[#allocation15 + $0x8] sm:$0xff] }
 0x407   : > { %1235 = vmatpush.bf16.msrb.mxu3 %v1563_v10 }
 0x408   : > { %836 = vst.msk [vmem:[#allocation4] sm:$0xff] %vm664_vm4, %v834_v13 }
 0x40f   : > { %v1165_v35 = vld [vmem:[#allocation4] sm:$0xff] }
 0x418   : > { %v933_v50 = vpop.permute.xlu0 %932 }
 0x419   : > { %v935_v52 = vmul.f32 %v933_v50, %v929_v51 }
 0x44a   : > { %v925_v17 = vpop.xlane.xlu1 %924 }
 0x44b   : > { %v926_v18 = vadd.f32 %v925_v17, %v922_v16 }
 0x44d   : > { %927 = vst.msk [vmem:[#allocation4 + $0x8] sm:$0xff] %vm664_vm4, %v926_v18 }
 0x452   : > { %v1113_v22 = vpop.xlane.xlu2 %1112 }
 0x453   : > { %v1114_v23 = vadd.f32 %v1113_v22, %v1110_v21 }
 0x454   : > { %v1175_v32 = vld [vmem:[#allocation4 + $0x8] sm:$0xff] }
 0x455   : > { %1115 = vst.msk [vmem:[#allocation4 + $0x18] sm:$0xff] %vm664_vm4, %v1114_v23 }
 0x45b   : > { %v952_v25 = vpop.f32.mrf.mxu2 }
 0x45c   : > { %957 = vrot.lane.b32.xlu1 %v952_v25, %s2054_s19  ;;  %v1195_v42 = vld [vmem:[#allocation4 + $0x18] sm:$0xff] }
 0x45d   : > { %v1019_v27 = vpop.xlane.xlu2 %1018 }
 0x45e   : > { %v1020_v28 = vadd.f32 %v1019_v27, %v1016_v26 }
 0x460   : > { %1021 = vst.msk [vmem:[#allocation4 + $0x10] sm:$0xff] %vm664_vm4, %v1020_v28 }
 0x463   : > { %v954_v29 = vpop.f32.mrf.mxu2 }
 0x465   : > { %v1027_v55 = vpop.permute.xlu2 %1026 }
 0x467   : > { %v1185_v30 = vld [vmem:[#allocation4 + $0x10] sm:$0xff] }
 0x468   : > { %v1046_v31 = vpop.f32.mrf.mxu0  ;;  %1712 = vrcp.f32 %v1185_v30 }
 0x469   : > { %1051 = vrot.lane.b32.xlu0 %v1046_v31, %s2055_s14  ;;  %1714 = vrcp.f32 %v926_v18 }
 0x46a   : > { %1716 = vrcp.f32 %v1175_v32 }
 0x46b   : > { %v1140_v33 = vpop.f32.mrf.mxu2  ;;  %1718 = vrcp.f32 %v834_v13  ;;  %v1562_v13 = vld [vmem:[#allocation15] sm:$0xff] }
 0x46c   : > { %1145 = vrot.lane.b32.xlu1 %v1140_v33, %s2056_s30  ;;  %1720 = vrcp.f32 %v1165_v35  ;;  %1236 = vmatpush.bf16.msrb.mxu3 %v1562_v13 }
 0x46d   : > { %1722 = vrcp.f32 %v1114_v23 }
 0x46e   : > { %v1713_v34 = vpop.eup %1712  ;;  %1724 = vrcp.f32 %v1195_v42 }
 0x46f   : > { %1189 = vperm.xlu2 %1692, %v1713_v34   ;;  %v1715_v37 = vpop.eup %1714  ;;  %1726 = vrcp.f32 %v1020_v28 }
 0x470   : > { %v1048_v36 = vpop.f32.mrf.mxu0  ;;  %v1717_v38 = vpop.eup %1716  ;;  %v964_v40 = vmul.f32 0.25, %v1715_v37 }
 0x471   : > { %1120 = vperm.xlu0 %1690, %v1711_v19   ;;  %v1719_v41 = vpop.eup %1718 }
 0x472   : > { %v1721_v43 = vpop.eup %1720  ;;  %v871_v44 = vmul.f32 0.25, %v1719_v41 }
 0x473   : > { %v1142_v39 = vpop.f32.mrf.mxu2  ;;  %v1723_v45 = vpop.eup %1722 }
 0x474   : > { %1179 = vperm.xlu1 %1691, %v1717_v38   ;;  %v1725_v46 = vpop.eup %1724  ;;  %v1152_v47 = vmul.f32 0.25, %v1723_v45 }
 0x475   : > { %v1727_v48 = vpop.eup %1726 }
 0x476   : > { %v1058_v49 = vmul.f32 0.25, %v1727_v48 }
 0x477   : > { %967 = vperm.xlu2 %1692, %v964_v40  }
 0x479   : > { %1169 = vperm.xlu0 %1690, %v1721_v43  }
 0x47c   : > { %874 = vperm.xlu1 %1691, %v871_v44  }
 0x481   : > { %1199 = vperm.xlu0 %1690, %v1725_v46  }
 0x484   : > { %1155 = vperm.xlu1 %1691, %v1152_v47  }
 0x489   : > { %1061 = vperm.xlu0 %1690, %v1058_v49  }
 0x4c9   : > { %v1190_v6 = vpop.permute.xlu2 %1189 }
 0x4ce   : > { %v958_v53 = vpop.permute.xlu1 %957 }
 0x4cf   : > { %v960_v54 = vadd.f32 %v958_v53, %v935_v52 }
 0x4d1   : > { %962 = vst.msk [vmem:[#allocation5] sm:$0xff] %vm961_vm6, %v960_v54  ;;  %v968_v14 = vpop.permute.xlu2 %967 }
 0x4d2   : > { %v970_v16 = vmul.f32 %v2382_v57, %v968_v14 }
 0x4d8   : > { %v1023_v56 = vld [vmem:[#allocation5] sm:$0xff] }
 0x4d9   : > { %v1029_v58 = vmul.f32 %v1027_v55, %v1023_v56 }
 0x4db   : > { %v1052_v59 = vpop.permute.xlu0 %1051 }
 0x4dc   : > { %v1054_v60 = vadd.f32 %v1052_v59, %v1029_v58 }
 0x4de   : > { %1056 = vst.msk [vmem:[#allocation5] sm:$0xff] %vm1055_vm7, %v1054_v60  ;;  %v1146_v61 = vpop.permute.xlu1 %1145 }
 0x4e3   : > { %v1121_v63 = vpop.permute.xlu0 %1120 }
 0x4e5   : > { %v1117_v0 = vld [vmem:[#allocation5] sm:$0xff] }
 0x4e6   : > { %v1123_v1 = vmul.f32 %v1121_v63, %v1117_v0  ;;  %v1180_v2 = vpop.permute.xlu1 %1179 }
 0x4e8   : > { %v1148_v3 = vadd.f32 %v1146_v61, %v1123_v1 }
 0x4ea   : > { %1150 = vst.msk [vmem:[#allocation5] sm:$0xff] %vm1149_vm8, %v1148_v3 }
 0x4eb   : > { %v1170_v5 = vpop.permute.xlu0 %1169 }
 0x4ee   : > { %v875_v8 = vpop.permute.xlu1 %874 }
 0x4ef   : > { %v877_v15 = vmul.f32 %v2340_v12, %v875_v8 }
 0x4f1   : > { %v1164_v7 = vld [vmem:[#allocation5] sm:$0xff]  ;;  %v971_v21 = vadd.f32 %v970_v16, %v877_v15 }
 0x4f2   : > { %v1172_v9 = vmul.f32 %v1170_v5, %v1164_v7 }
 0x4f3   : > { %v1200_v11 = vpop.permute.xlu0 %1199 }
 0x4f4   : > { %1173 = vst.msk [vmem:[#allocation5] sm:$0xff] %vm791_vm3, %v1172_v9 }
 0x4f6   : > { %v1156_v18 = vpop.permute.xlu1 %1155 }
 0x4f7   : > { %v1158_v23 = vmul.f32 %v2389_v62, %v1156_v18 }
 0x4fb   : > { %v1174_v17 = vld [vmem:[#allocation5] sm:$0xff]  ;;  %v1062_v19 = vpop.permute.xlu0 %1061 }
 0x4fc   : > { %v1182_v20 = vmul.f32 %v1180_v2, %v1174_v17  ;;  %v1064_v22 = vmul.f32 %v2396_v4, %v1062_v19 }
 0x4fe   : > { %1183 = vst.msk [vmem:[#allocation5] sm:$0xff] %vm961_vm6, %v1182_v20  ;;  %v1065_v24 = vadd.f32 %v1064_v22, %v971_v21 }
 0x500   : > { %v1159_v25 = vadd.f32 %v1158_v23, %v1065_v24 }
 0x502   : > { %1160 = vst.msk [vmem:[%s605_s27] sm:$0xff] %vm813_vm5, %v1159_v25 }
 0x505   : > { %v1184_v12 = vld [vmem:[#allocation5] sm:$0xff] }
 0x506   : > { %v1192_v57 = vmul.f32 %v1190_v6, %v1184_v12 }
 0x508   : > { %1193 = vst.msk [vmem:[#allocation5] sm:$0xff] %vm1055_vm7, %v1192_v57 }
 0x50f   : > { %v1194_v26 = vld [vmem:[#allocation5] sm:$0xff] }
 0x510   : > { %v1202_v27 = vmul.f32 %v1200_v11, %v1194_v26 }
 0x512   : > { %1203 = vst.msk [vmem:[#allocation5] sm:$0xff] %vm1149_vm8, %v1202_v27 }
 0x519   : > { %v1204_v4 = vld [vmem:[#allocation5] sm:$0xff] }
 0x51a   : > { %v1205_v28 = vpack.c.bf16 %v1204_v4, %v1204_v4 }
 0x51c   : > { %1547 = vmatmul.msk.bf16.vlgmr.msrb.gmra.mxu3 %vm644_vm0, %v1205_v28 }
 0x51d   : > { %1935 = shalt.err (!%p1932_p0)
}
 0x51e   : > { %1585 = dma.vmem_to_hbm [thread:$0]  (%p2214_p2), %s1278_s10, 128, %s1280_s11, %s1249_s21  }
 0x51f   : > { %s2522_s14 = sld [smem:[#allocation38_spill]]  ;;  %s598_s4 = scalar_lea.vmem [#allocation17], %s2252_s5 }
 0x520   : > { %s2523_s3 = sld [smem:[#allocation37_spill]]  ;;  %s1262_s29 = sshll.u32 %s598_s4, 4  ;;  %s1263_s29 = int_to_ptr.vmem [resolvable:$true] %s1262_s29 }
 0x521   : > { %s1244_s13 = scalar_lea.sflag [#allocation8], %s2249_s23 }
 0x525   : > { %s1260_s30 = scalar_lea.hbm %s2522_s14, %s1550_s15  ;;  %s1956_s5 = scalar_lea.hbm %s2522_s14, 16 }
 0x526   : > { %v1695_v62 = vld [vmem:[%s2523_s3] ss:$0 sm:$0xff]  ;;  %s1264_s0 = sshll.u32 %s1260_s30, 4  ;;  %s1265_s0 = int_to_ptr.hbm [resolvable:$true] %s1264_s0 }
 0x527   : > { %s1950_s10 = sshra.s32 %s1265_s0, 4  ;;  %s1951_s10 = int_to_ptr.hbm [resolvable:$true] %s1950_s10 }
 0x528   : > { %s1952_s11 = scalar_lea.hbm %s1951_s10, 8  ;;  %p1957_p3 = scmp.lt.s32.totalorder %s1951_s10, %s2522_s14 }
 0x529   : > { %p1953_p4 = scmp.ne.s32.totalorder %s1951_s10, %s1952_s11  ;;  %p1958_p1 = scmp.lt.s32.totalorder %s1956_s5, %s1952_s11 }
 0x52b   : > { %p1954_p7 = pnand %p1953_p4, %p2214_p2  ;;  %p1959_p9 = por %p1958_p1, %p1957_p3 }
 0x52d   : > { %p1955_p8 = pneg %p1954_p7 }
 0x52f   : > { %p1960_p10 = pnand %p1959_p9, %p1955_p8 }
 0x59f   : > { %v1238_v29 = vpop.f32.mrf.mxu3 }
 0x5a0   : > { %v1239_v30 = vadd.f32 %v1695_v62, %v1238_v29 }
 0x5a2   : > { %1242 = vst.msk [vmem:[%s598_s4] sm:$0xff] %vm644_vm0, %v1239_v30 }
 0x5a3   : > { %1963 = shalt.err (!%p1960_p10)
}
 0x5a4   : > { %1584 = dma.vmem_to_hbm [thread:$0]  (%p2214_p2), %s1263_s29, 128, %s1265_s0, %s1244_s13  }
 0x5a7   : > { %v1240_v31 = vpop.f32.mrf.mxu3 }
 0x5a8 PF: > { %s2524_s23 = sld [smem:[#allocation27_spill]]  ;;  %p1609_p11 = pnand %p1486_p6, %p2221_p5 }
 0x5aa   : > { %p1610_p12 = pneg %p1609_p11 }
 0x5ae   : > { %s1291_s16 = sand.u32 1, %s2524_s23  }
 0x5af   : > { %s1292_s18 = scalar_lea.sflag [#allocation8], %s1291_s16 }
 0x5b0   : > { %2009 = dma.done.wait (%p1610_p12), %s1292_s18, 128  }
 0x5b1   : > { %2011 = vsyncadd (%p1610_p12), %s1292_s18, 4294967168  ;;  %s1302_s19 = scalar_lea.sflag [#allocation19], %s1291_s16 }
 0x5b2   : > { %2013 = dma.done.wait (%p1610_p12), %s1302_s19, 128  }
 0x5b3   : > { %2015 = vsyncadd (%p1610_p12), %s1302_s19, 4294967168  ;;  %s37_s26 = sadd.s32 1, %s2038_s26   ;;  %s2526_s20 = sld [smem:[#allocation28_spill]] }
 0x5b4   : > { %p34_p13 = scmp.ge.s32.totalorder %s37_s26, 4   ;;  %s2527_s23 = sld [smem:[#allocation30_spill]] }
 0x5b5   : > { %s2528_s30 = sld [smem:[#allocation29_spill]]  ;;  %s2529_s21 = smov %s2022_s22 }
 0x5b6   : > { %s2531_s24 = smov %s2034_s25 }
 0x5b7   :  { %36 = sbr.rel (!%p34_p13) target bundleno = 20 (0x14), region = 172 }
 0x5b9   : > { %s2530_s22 = smov %s2526_s20 }
 0x5bb   : > { %s2532_s25 = smov %s2528_s30 }
 0x5bc   :  { %1308 = vsyncpa [#allocation7], 1 }
 0x5bd   :  { %1310 = vsyncpa [#allocation7 + $0x1], 1 }
 0x5be   :  { %1311 = vsyncpa [#allocation10], 1 }
 0x5bf   :  { %1313 = vsyncpa [#allocation10 + $0x1], 1 }
 0x5c0   :  { %1314 = vsyncpa [#allocation13], 1 }
 0x5c1   :  { %1315 = vsyncpa [#allocation16], 1 }
 0x5c2   :  { %1316 = vsyncpa [#allocation8], 1 }
 0x5c3   :  { %1318 = vsyncpa [#allocation8 + $0x1], 1 }
 0x5c4   :  { %1319 = vsyncpa [#allocation19], 1 }
 0x5c5   :  { %1321 = vsyncpa [#allocation19 + $0x1], 1 }

</bundles_post_ra>
